<compile_context>
chip_gen: v7x
topology: tpu7x:2x2x1
jax: 0.10.0
libtpu: 0.0.40
codegen_flags: <defaults>
</compile_context>

<pallas_src>
import functools

import numpy as np
import jax
import jax.numpy as jnp
from jax.experimental import pallas as pl
from jax.experimental.pallas import tpu as pltpu

VMEM = pl.BlockSpec(memory_space=pltpu.MemorySpace.VMEM)
OUT_LANES = 128          # lane-dense slab width (output & packed params)
LN_EPS = 1e-5
N_HIT_CLASSES = 2        # binary_hit_preds=True
N_VEC_ROWS = 12          # packed 1-row vectors in the parameter slab


def _ln(x, gamma, beta):
    """PyTorch-style LayerNorm (biased variance, eps inside the sqrt)."""
    mu = jnp.mean(x, axis=-1, keepdims=True)
    xc = x - mu
    var = jnp.mean(xc * xc, axis=-1, keepdims=True)
    return xc * jax.lax.rsqrt(var + LN_EPS) * gamma + beta


def _slab_layout(md, pd, bd, batch, n_b):
    """Static row offsets of the packed parameter/constant slab (width 128)."""
    b9 = batch * n_b
    o = {}
    o["wm"] = 0                               # packed matchup-chunk head weights (md rows)
    o["wp"] = md                              # packed pitcher-chunk head weights (pd rows)
    o["wb"] = md + pd                         # packed batter-chunk head weights  (bd rows)
    o["w_stat"] = md + pd + bd                # pitcher_stat_proj weight (n_b*md rows, cols 0:md)
    o["w_bproj"] = o["w_stat"] + n_b * md     # batter_proj weight       (n_b*bd rows, cols 0:bd)
    o["r"] = o["w_bproj"] + n_b * bd          # replication matrix R     (b9 rows, cols 0:batch)
    o["vec"] = o["r"] + b9                    # 12 packed 1-row vectors
    o["total"] = o["vec"] + N_VEC_ROWS
    return o


# Vec-row indices (relative to layout["vec"]):
#  0: bias_pack [b_pph | b_bph | b_hh | 0...]      6: g_be_ln
#  1: b_stat                                        7: b_be_ln
#  2: g_stat_ln                                     8: b_bproj
#  3: b_stat_ln                                     9: g_bp_ln
#  4: g_pe_ln                                      10: b_bp_ln
#  5: b_pe_ln                                      11: lane ids 0..127 (class ids)


# ---------------------------------------------------------------------------
# Parameter construction (xavier-uniform like the PyTorch init)
# ---------------------------------------------------------------------------
def xavier_uniform(key, fan_in, fan_out):
    bound = (6.0 / (fan_in + fan_out)) ** 0.5
    return jax.random.uniform(key, (fan_in, fan_out), jnp.float32,
                              minval=-bound, maxval=bound)   # stored (in, out)


def init_params(key, *, pitcher_dim, batter_dim, matchup_dim,
                n_pitcher_targets, n_batter_targets):
    combined = matchup_dim + pitcher_dim + batter_dim
    keys = jax.random.split(key, 8)
    return {
        # pitcher_stat_proj : Linear(9*matchup_dim -> matchup_dim)
        "W_stat": xavier_uniform(keys[0], 9 * matchup_dim, matchup_dim),
        "b_stat": jnp.zeros((matchup_dim,), jnp.float32),
        # batter_proj : Linear(9*batter_dim -> batter_dim)
        "W_bproj": xavier_uniform(keys[1], 9 * batter_dim, batter_dim),
        "b_bproj": jnp.zeros((batter_dim,), jnp.float32),
        # heads over the combined axis [matchup | pitcher | batter]
        "W_pph": xavier_uniform(keys[2], combined, n_pitcher_targets),
        "b_pph": jnp.zeros((n_pitcher_targets,), jnp.float32),
        "W_bph": xavier_uniform(keys[3], combined, n_batter_targets),
        "b_bph": jnp.zeros((n_batter_targets,), jnp.float32),
        "W_hh": xavier_uniform(keys[4], combined, N_HIT_CLASSES),
        "b_hh": jnp.zeros((N_HIT_CLASSES,), jnp.float32),
        # layer norms (do_ln=True)
        "g_stat_ln": jnp.ones((matchup_dim,), jnp.float32),
        "b_stat_ln": jnp.zeros((matchup_dim,), jnp.float32),
        "g_pe_ln": jnp.ones((pitcher_dim,), jnp.float32),
        "b_pe_ln": jnp.zeros((pitcher_dim,), jnp.float32),
        "g_be_ln": jnp.ones((batter_dim,), jnp.float32),
        "b_be_ln": jnp.zeros((batter_dim,), jnp.float32),
        "g_bp_ln": jnp.ones((batter_dim,), jnp.float32),
        "b_bp_ln": jnp.zeros((batter_dim,), jnp.float32),
    }


def pack_params(params, batch_size, n_batters=9):
    """Pack every weight/bias/LN param + constant R + class-id row into ONE
    lane-dense (rows, 128) f32 slab -> a single input DMA for the kernel."""
    MD = params["W_stat"].shape[1]
    PD = params["g_pe_ln"].shape[0]
    BD = params["W_bproj"].shape[1]
    npt = params["W_pph"].shape[1]
    nbt = params["W_bph"].shape[1]
    nhh = params["W_hh"].shape[1]
    B9 = batch_size * n_batters
    assert npt + nbt + nhh + 3 <= OUT_LANES
    off = _slab_layout(MD, PD, BD, batch_size, n_batters)

    g = lambda k: np.asarray(params[k], np.float32)
    slab = np.zeros((off["total"], OUT_LANES), np.float32)

    # Head weights split along the combined [matchup|pitcher|batter] input axis
    # and packed column-wise into the output-slab lanes:
    #   cols [0,npt)        -> pitcher_pred_head   (only meaningful for pitcher rows)
    #   cols [npt,npt+nbt)  -> batter_pred_head
    #   cols [npt+nbt,+nhh) -> batter_has_hit_pred_head
    def put_heads(row0, a, b):
        slab[row0:row0 + (b - a), 0:npt] = g("W_pph")[a:b]
        slab[row0:row0 + (b - a), npt:npt + nbt] = g("W_bph")[a:b]
        slab[row0:row0 + (b - a), npt + nbt:npt + nbt + nhh] = g("W_hh")[a:b]

    put_heads(off["wm"], 0, MD)
    put_heads(off["wp"], MD, MD + PD)
    put_heads(off["wb"], MD + PD, MD + PD + BD)

    slab[off["w_stat"]:off["w_stat"] + n_batters * MD, 0:MD] = g("W_stat")
    slab[off["w_bproj"]:off["w_bproj"] + n_batters * BD, 0:BD] = g("W_bproj")

    # pitcher-embedding replication matrix: R[r, i] = 1 iff r // n_batters == i
    rows = np.arange(B9) // n_batters
    slab[off["r"]:off["r"] + B9, 0:batch_size] = (
        rows[:, None] == np.arange(batch_size)[None, :]).astype(np.float32)

    v = off["vec"]
    slab[v + 0, 0:npt] = g("b_pph")
    slab[v + 0, npt:npt + nbt] = g("b_bph")
    slab[v + 0, npt + nbt:npt + nbt + nhh] = g("b_hh")
    slab[v + 1, 0:MD] = g("b_stat")
    slab[v + 2, 0:MD] = g("g_stat_ln")
    slab[v + 3, 0:MD] = g("b_stat_ln")
    slab[v + 4, 0:PD] = g("g_pe_ln")
    slab[v + 5, 0:PD] = g("b_pe_ln")
    slab[v + 6, 0:BD] = g("g_be_ln")
    slab[v + 7, 0:BD] = g("b_be_ln")
    slab[v + 8, 0:BD] = g("b_bproj")
    slab[v + 9, 0:BD] = g("g_bp_ln")
    slab[v + 10, 0:BD] = g("b_bp_ln")
    slab[v + 11, :] = np.arange(OUT_LANES, dtype=np.float32)   # class-id lane row
    return jnp.asarray(slab)


# ---------------------------------------------------------------------------
# Forward pass (config: use_pitcher=True, use_batter=True, use_matchup_data=True,
#               do_ln=True, binary_hit_preds=True, single_model=False,
#               entity_models=False, loss_type='mse', injury_mode=False)
# ---------------------------------------------------------------------------
@functools.partial(jax.jit, static_argnames=("n_batters",))
def model_finetuner_forward(param_slab, p_embds, b_embds, matchup_inputs,
                            pitcher_targets, batter_targets,
                            batter_has_hit_labels, n_batters=9):
    B, PD = p_embds.shape
    MD = matchup_inputs.shape[-1]
    BD = b_embds.shape[-1]
    n_b = n_batters
    B9 = B * n_b
    npt = pitcher_targets.shape[-1]
    nbt = batter_targets.shape[-1]
    nhh = N_HIT_CLASSES
    lcol = npt + nbt + nhh
    assert lcol + 3 <= OUT_LANES
    off = _slab_layout(MD, PD, BD, B, n_b)
    assert param_slab.shape == (off["total"], OUT_LANES)
    vo = off["vec"]

    def kernel(prm, mp, mb, pe, be, bsm, ptt, btt, lbl, out_ref):
        f32 = jnp.float32

        def vec(i, width):                       # packed 1-row vector
            return prm[vo + i:vo + i + 1, 0:width]

        # --- pitcher_stat_proj + LN ------------------------------------------
        w_stat = prm[off["w_stat"]:off["w_stat"] + n_b * MD, 0:MD]
        stat = jnp.dot(mp[...], w_stat, preferred_element_type=f32) + vec(1, MD)
        stat = _ln(stat, vec(2, MD), vec(3, MD))                 # (B, MD)

        # --- embedding layer norms -------------------------------------------
        p_ln = _ln(pe[...], vec(4, PD), vec(5, PD))              # (B, PD)
        g_be, b_be = vec(6, BD), vec(7, BD)
        b_ln = _ln(be[...], g_be, b_be)                          # (B9, BD)

        # --- batter_proj: contiguous per-slot slices of the slot-major copy ---
        acc = None
        for j in range(n_b):
            rows_ln = _ln(bsm[j * B:(j + 1) * B, :], g_be, b_be)  # (B, BD)
            w_j = prm[off["w_bproj"] + j * BD:off["w_bproj"] + (j + 1) * BD, 0:BD]
            t = jnp.dot(rows_ln, w_j, preferred_element_type=f32)
            acc = t if acc is None else acc + t
        b_proj = _ln(acc + vec(8, BD), vec(9, BD), vec(10, BD))   # (B, BD)

        # --- packed 128-lane head computation (batter rows) -------------------
        wm = prm[off["wm"]:off["wm"] + MD, :]                    # (MD, 128)
        wp = prm[off["wp"]:off["wp"] + PD, :]                    # (PD, 128)
        wb = prm[off["wb"]:off["wb"] + BD, :]                    # (BD, 128)
        bias = prm[vo:vo + 1, :]                                 # (1, 128)
        R = prm[off["r"]:off["r"] + B9, 0:B]                     # (B9, B)

        p_part = jnp.dot(p_ln, wp, preferred_element_type=f32)   # (B, 128)
        slab = (jnp.dot(mb[...], wm, preferred_element_type=f32)
                + jnp.dot(R, p_part, preferred_element_type=f32)
                + jnp.dot(b_ln, wb, preferred_element_type=f32)
                + bias)                                          # (B9, 128)

        # --- pitcher head (B rows): reuse p_part's cols 0:npt ------------------
        pp = (jnp.dot(stat, prm[off["wm"]:off["wm"] + MD, 0:npt],
                      preferred_element_type=f32)
              + jnp.dot(b_proj, prm[off["wb"]:off["wb"] + BD, 0:npt],
                        preferred_element_type=f32)
              + p_part[:, 0:npt]
              + bias[:, 0:npt])                                  # (B, npt)

        # --- losses (reduced in-kernel) ---------------------------------------
        dp = pp - ptt[...]
        p_loss = jnp.mean(dp * dp, keepdims=True)                # (1, 1)

        bt_preds = slab[:, npt:npt + nbt]
        db = bt_preds - btt[...]
        b_loss = jnp.mean(db * db, keepdims=True)                # (1, 1)

        hh = slab[:, npt + nbt:npt + nbt + nhh]                  # (B9, nhh)
        mmax = jnp.max(hh, axis=-1, keepdims=True)
        lse = mmax + jnp.log(jnp.sum(jnp.exp(hh - mmax), axis=-1, keepdims=True))
        cls = vec(11, nhh)                                       # (1, nhh) = [0,1,..]
        mask = (lbl[...] == cls).astype(f32)                     # (B9, nhh)
        picked = jnp.sum(mask * hh, axis=-1, keepdims=True)      # (B9, 1)
        h_loss = jnp.mean(lse - picked, keepdims=True)           # (1, 1)

        # --- stores: one dense slab store + tiny masked sub-slice stores -------
        out_ref[...] = slab
        out_ref[0:B, 0:npt] = pp                                 # pitcher preds
        out_ref[0:1, lcol:lcol + 1] = p_loss
        out_ref[0:1, lcol + 1:lcol + 2] = b_loss
        out_ref[0:1, lcol + 2:lcol + 3] = h_loss

    # --- wrapper-side layout plumbing (free / tiny) ---------------------------
    matchup_p = matchup_inputs.reshape(B, n_b * MD)
    matchup_b = matchup_inputs.reshape(B9, MD)
    # slot-major copy: row j*B + i = (batch i, slot j) -> contiguous slot slices
    b_slotmajor = b_embds.reshape(B, n_b, BD).transpose(1, 0, 2).reshape(B9, BD)
    bt_tgt = batter_targets.reshape(B9, nbt)
    labels_f32 = batter_has_hit_labels.reshape(B9, 1).astype(jnp.float32)

    inputs = (param_slab, matchup_p, matchup_b, p_embds, b_embds,
              b_slotmajor, pitcher_targets, bt_tgt, labels_f32)

    out = pl.pallas_call(
        kernel,
        out_shape=jax.ShapeDtypeStruct((B9, OUT_LANES), jnp.float32),
        in_specs=[VMEM] * len(inputs),
        out_specs=VMEM,
        # Working set is ~0.3 MiB; well inside every generation's VMEM.
        compiler_params=pltpu.CompilerParams(vmem_limit_bytes=32 * 1024 * 1024),
    )(*inputs)

    pitcher_preds = out[:B, 0:npt]
    batter_preds = out[:, npt:npt + nbt]
    hit_preds = out[:, npt + nbt:npt + nbt + nhh]
    pitcher_loss = out[0, lcol]
    batter_loss = out[0, lcol + 1]
    batter_has_hit_loss = out[0, lcol + 2]
    return (pitcher_loss, batter_loss, batter_has_hit_loss,
            pitcher_preds, batter_preds, hit_preds)


# ---------------------------------------------------------------------------
if __name__ == "__main__":
    B = 2
    N_BATTERS = 9
    PITCHER_DIM = 32
    BATTER_DIM = 32
    MATCHUP_DIM = 16
    N_PITCHER_TARGETS = 2
    N_BATTER_TARGETS = 2

    key = jax.random.PRNGKey(0)
    k_param, k_p, k_b, k_m, k_pt, k_bt, k_lbl = jax.random.split(key, 7)

    params = init_params(
        k_param,
        pitcher_dim=PITCHER_DIM,
        batter_dim=BATTER_DIM,
        matchup_dim=MATCHUP_DIM,
        n_pitcher_targets=N_PITCHER_TARGETS,
        n_batter_targets=N_BATTER_TARGETS,
    )
    param_slab = pack_params(params, batch_size=B, n_batters=N_BATTERS)

    # synthetic encoder outputs (stand-ins for pitcher/batter model embeddings)
    p_embds = jax.random.normal(k_p, (B, PITCHER_DIM), jnp.float32)
    b_embds = jax.random.normal(k_b, (B * N_BATTERS, BATTER_DIM), jnp.float32)
    matchup_inputs = jax.random.normal(k_m, (B, N_BATTERS, MATCHUP_DIM), jnp.float32)
    pitcher_targets = jax.random.normal(k_pt, (B, N_PITCHER_TARGETS), jnp.float32)
    batter_targets = jax.random.normal(
        k_bt, (B, N_BATTERS, N_BATTER_TARGETS), jnp.float32
    )
    batter_has_hit_labels = jax.random.randint(
        k_lbl, (B, N_BATTERS), 0, 2, jnp.int32
    )

    outputs = model_finetuner_forward(
        param_slab, p_embds, b_embds, matchup_inputs,
        pitcher_targets, batter_targets, batter_has_hit_labels,
        n_batters=N_BATTERS,
    )
    outputs = jax.block_until_ready(outputs)

    (pitcher_loss, batter_loss, batter_has_hit_loss,
     pitcher_preds, batter_preds, has_hit_preds) = outputs

    assert pitcher_preds.shape == (B, N_PITCHER_TARGETS)
    assert batter_preds.shape == (B * N_BATTERS, N_BATTER_TARGETS)
    assert has_hit_preds.shape == (B * N_BATTERS, N_HIT_CLASSES)
    assert jnp.isfinite(pitcher_loss) and jnp.isfinite(batter_loss)
    assert jnp.isfinite(batter_has_hit_loss)

    print("KERNEL_OK")
</pallas_src>

<mosaic_0001>
module attributes {stable_mosaic.version = 11 : i64} {
  func.func @kernel(%arg0: memref<542x128xf32, #tpu.memory_space<vmem>>, %arg1: memref<2x144xf32, #tpu.memory_space<vmem>>, %arg2: memref<18x16xf32, #tpu.memory_space<vmem>>, %arg3: memref<2x32xf32, #tpu.memory_space<vmem>>, %arg4: memref<18x32xf32, #tpu.memory_space<vmem>>, %arg5: memref<18x32xf32, #tpu.memory_space<vmem>>, %arg6: memref<2x2xf32, #tpu.memory_space<vmem>>, %arg7: memref<18x2xf32, #tpu.memory_space<vmem>>, %arg8: memref<18x1xf32, #tpu.memory_space<vmem>>, %arg9: memref<18x128xf32, #tpu.memory_space<vmem>>) attributes {dimension_semantics = [], scalar_prefetch = 0 : i64, scratch_operands = 0 : i64, tpu.core_type = #tpu.core_type<tc>} {
    %c80 = arith.constant 80 : index
    %c0 = arith.constant 0 : index
    %0 = vector.load %arg0[%c80, %c0] : memref<542x128xf32, #tpu.memory_space<vmem>>, vector<144x16xf32>
    %c0_0 = arith.constant 0 : index
    %c0_1 = arith.constant 0 : index
    %1 = vector.load %arg1[%c0_0, %c0_1] : memref<2x144xf32, #tpu.memory_space<vmem>>, vector<2x144xf32>
    %cst = arith.constant dense<0.000000e+00> : vector<2x16xf32>
    %2 = tpu.matmul %1, %0, %cst {dimension_numbers = #tpu.dot_dimension_numbers<[1], [0], [0], [1], [0, 0, 1, 1], [], []>} : vector<2x144xf32>, vector<144x16xf32>, vector<2x16xf32> -> vector<2x16xf32>
    %c531 = arith.constant 531 : index
    %c0_2 = arith.constant 0 : index
    %3 = vector.load %arg0[%c531, %c0_2] : memref<542x128xf32, #tpu.memory_space<vmem>>, vector<1x16xf32>
    %4 = vector.broadcast %3 : vector<1x16xf32> to vector<2x16xf32>
    %5 = arith.addf %2, %4 : vector<2x16xf32>
    %c532 = arith.constant 532 : index
    %c0_3 = arith.constant 0 : index
    %6 = vector.load %arg0[%c532, %c0_3] : memref<542x128xf32, #tpu.memory_space<vmem>>, vector<1x16xf32>
    %c533 = arith.constant 533 : index
    %c0_4 = arith.constant 0 : index
    %7 = vector.load %arg0[%c533, %c0_4] : memref<542x128xf32, #tpu.memory_space<vmem>>, vector<1x16xf32>
    %cst_5 = arith.constant dense<0.000000e+00> : vector<2xf32>
    %8 = vector.multi_reduction <add>, %5, %cst_5 [1] : vector<2x16xf32> to vector<2xf32>
    %9 = vector.shape_cast %8 : vector<2xf32> to vector<2x1xf32>
    %cst_6 = arith.constant 1.600000e+01 : f32
    %10 = vector.broadcast %cst_6 : f32 to vector<2x1xf32>
    %11 = arith.divf %9, %10 : vector<2x1xf32>
    %12 = vector.broadcast %11 : vector<2x1xf32> to vector<2x16xf32>
    %13 = arith.subf %5, %12 : vector<2x16xf32>
    %14 = arith.mulf %13, %13 : vector<2x16xf32>
    %cst_7 = arith.constant dense<0.000000e+00> : vector<2xf32>
    %15 = vector.multi_reduction <add>, %14, %cst_7 [1] : vector<2x16xf32> to vector<2xf32>
    %16 = vector.shape_cast %15 : vector<2xf32> to vector<2x1xf32>
    %cst_8 = arith.constant 1.600000e+01 : f32
    %17 = vector.broadcast %cst_8 : f32 to vector<2x1xf32>
    %18 = arith.divf %16, %17 : vector<2x1xf32>
    %cst_9 = arith.constant 9.99999974E-6 : f32
    %19 = vector.broadcast %cst_9 : f32 to vector<2x1xf32>
    %20 = arith.addf %18, %19 : vector<2x1xf32>
    %21 = math.rsqrt %20 : vector<2x1xf32>
    %22 = vector.broadcast %21 : vector<2x1xf32> to vector<2x16xf32>
    %23 = arith.mulf %13, %22 : vector<2x16xf32>
    %24 = vector.broadcast %6 : vector<1x16xf32> to vector<2x16xf32>
    %25 = arith.mulf %23, %24 : vector<2x16xf32>
    %26 = vector.broadcast %7 : vector<1x16xf32> to vector<2x16xf32>
    %27 = arith.addf %25, %26 : vector<2x16xf32>
    %c0_10 = arith.constant 0 : index
    %c0_11 = arith.constant 0 : index
    %28 = vector.load %arg3[%c0_10, %c0_11] : memref<2x32xf32, #tpu.memory_space<vmem>>, vector<2x32xf32>
    %c534 = arith.constant 534 : index
    %c0_12 = arith.constant 0 : index
    %29 = vector.load %arg0[%c534, %c0_12] : memref<542x128xf32, #tpu.memory_space<vmem>>, vector<1x32xf32>
    %c535 = arith.constant 535 : index
    %c0_13 = arith.constant 0 : index
    %30 = vector.load %arg0[%c535, %c0_13] : memref<542x128xf32, #tpu.memory_space<vmem>>, vector<1x32xf32>
    %cst_14 = arith.constant dense<0.000000e+00> : vector<2xf32>
    %31 = vector.multi_reduction <add>, %28, %cst_14 [1] : vector<2x32xf32> to vector<2xf32>
    %32 = vector.shape_cast %31 : vector<2xf32> to vector<2x1xf32>
    %cst_15 = arith.constant 3.200000e+01 : f32
    %33 = vector.broadcast %cst_15 : f32 to vector<2x1xf32>
    %34 = arith.divf %32, %33 : vector<2x1xf32>
    %35 = vector.broadcast %34 : vector<2x1xf32> to vector<2x32xf32>
    %36 = arith.subf %28, %35 : vector<2x32xf32>
    %37 = arith.mulf %36, %36 : vector<2x32xf32>
    %cst_16 = arith.constant dense<0.000000e+00> : vector<2xf32>
    %38 = vector.multi_reduction <add>, %37, %cst_16 [1] : vector<2x32xf32> to vector<2xf32>
    %39 = vector.shape_cast %38 : vector<2xf32> to vector<2x1xf32>
    %cst_17 = arith.constant 3.200000e+01 : f32
    %40 = vector.broadcast %cst_17 : f32 to vector<2x1xf32>
    %41 = arith.divf %39, %40 : vector<2x1xf32>
    %cst_18 = arith.constant 9.99999974E-6 : f32
    %42 = vector.broadcast %cst_18 : f32 to vector<2x1xf32>
    %43 = arith.addf %41, %42 : vector<2x1xf32>
    %44 = math.rsqrt %43 : vector<2x1xf32>
    %45 = vector.broadcast %44 : vector<2x1xf32> to vector<2x32xf32>
    %46 = arith.mulf %36, %45 : vector<2x32xf32>
    %47 = vector.broadcast %29 : vector<1x32xf32> to vector<2x32xf32>
    %48 = arith.mulf %46, %47 : vector<2x32xf32>
    %49 = vector.broadcast %30 : vector<1x32xf32> to vector<2x32xf32>
    %50 = arith.addf %48, %49 : vector<2x32xf32>
    %c536 = arith.constant 536 : index
    %c0_19 = arith.constant 0 : index
    %51 = vector.load %arg0[%c536, %c0_19] : memref<542x128xf32, #tpu.memory_space<vmem>>, vector<1x32xf32>
    %c537 = arith.constant 537 : index
    %c0_20 = arith.constant 0 : index
    %52 = vector.load %arg0[%c537, %c0_20] : memref<542x128xf32, #tpu.memory_space<vmem>>, vector<1x32xf32>
    %c0_21 = arith.constant 0 : index
    %c0_22 = arith.constant 0 : index
    %53 = vector.load %arg4[%c0_21, %c0_22] : memref<18x32xf32, #tpu.memory_space<vmem>>, vector<18x32xf32>
    %cst_23 = arith.constant dense<0.000000e+00> : vector<18xf32>
    %54 = vector.multi_reduction <add>, %53, %cst_23 [1] : vector<18x32xf32> to vector<18xf32>
    %55 = vector.shape_cast %54 : vector<18xf32> to vector<18x1xf32>
    %cst_24 = arith.constant 3.200000e+01 : f32
    %56 = vector.broadcast %cst_24 : f32 to vector<18x1xf32>
    %57 = arith.divf %55, %56 : vector<18x1xf32>
    %58 = vector.broadcast %57 : vector<18x1xf32> to vector<18x32xf32>
    %59 = arith.subf %53, %58 : vector<18x32xf32>
    %60 = arith.mulf %59, %59 : vector<18x32xf32>
    %cst_25 = arith.constant dense<0.000000e+00> : vector<18xf32>
    %61 = vector.multi_reduction <add>, %60, %cst_25 [1] : vector<18x32xf32> to vector<18xf32>
    %62 = vector.shape_cast %61 : vector<18xf32> to vector<18x1xf32>
    %cst_26 = arith.constant 3.200000e+01 : f32
    %63 = vector.broadcast %cst_26 : f32 to vector<18x1xf32>
    %64 = arith.divf %62, %63 : vector<18x1xf32>
    %cst_27 = arith.constant 9.99999974E-6 : f32
    %65 = vector.broadcast %cst_27 : f32 to vector<18x1xf32>
    %66 = arith.addf %64, %65 : vector<18x1xf32>
    %67 = math.rsqrt %66 : vector<18x1xf32>
    %68 = vector.broadcast %67 : vector<18x1xf32> to vector<18x32xf32>
    %69 = arith.mulf %59, %68 : vector<18x32xf32>
    %70 = vector.broadcast %51 : vector<1x32xf32> to vector<18x32xf32>
    %71 = arith.mulf %69, %70 : vector<18x32xf32>
    %72 = vector.broadcast %52 : vector<1x32xf32> to vector<18x32xf32>
    %73 = arith.addf %71, %72 : vector<18x32xf32>
    %c0_28 = arith.constant 0 : index
    %c0_29 = arith.constant 0 : index
    %74 = vector.load %arg5[%c0_28, %c0_29] : memref<18x32xf32, #tpu.memory_space<vmem>>, vector<2x32xf32>
    %cst_30 = arith.constant dense<0.000000e+00> : vector<2xf32>
    %75 = vector.multi_reduction <add>, %74, %cst_30 [1] : vector<2x32xf32> to vector<2xf32>
    %76 = vector.shape_cast %75 : vector<2xf32> to vector<2x1xf32>
    %cst_31 = arith.constant 3.200000e+01 : f32
    %77 = vector.broadcast %cst_31 : f32 to vector<2x1xf32>
    %78 = arith.divf %76, %77 : vector<2x1xf32>
    %79 = vector.broadcast %78 : vector<2x1xf32> to vector<2x32xf32>
    %80 = arith.subf %74, %79 : vector<2x32xf32>
    %81 = arith.mulf %80, %80 : vector<2x32xf32>
    %cst_32 = arith.constant dense<0.000000e+00> : vector<2xf32>
    %82 = vector.multi_reduction <add>, %81, %cst_32 [1] : vector<2x32xf32> to vector<2xf32>
    %83 = vector.shape_cast %82 : vector<2xf32> to vector<2x1xf32>
    %cst_33 = arith.constant 3.200000e+01 : f32
    %84 = vector.broadcast %cst_33 : f32 to vector<2x1xf32>
    %85 = arith.divf %83, %84 : vector<2x1xf32>
    %cst_34 = arith.constant 9.99999974E-6 : f32
    %86 = vector.broadcast %cst_34 : f32 to vector<2x1xf32>
    %87 = arith.addf %85, %86 : vector<2x1xf32>
    %88 = math.rsqrt %87 : vector<2x1xf32>
    %89 = vector.broadcast %88 : vector<2x1xf32> to vector<2x32xf32>
    %90 = arith.mulf %80, %89 : vector<2x32xf32>
    %91 = vector.broadcast %51 : vector<1x32xf32> to vector<2x32xf32>
    %92 = arith.mulf %90, %91 : vector<2x32xf32>
    %93 = vector.broadcast %52 : vector<1x32xf32> to vector<2x32xf32>
    %94 = arith.addf %92, %93 : vector<2x32xf32>
    %c224 = arith.constant 224 : index
    %c0_35 = arith.constant 0 : index
    %95 = vector.load %arg0[%c224, %c0_35] : memref<542x128xf32, #tpu.memory_space<vmem>>, vector<32x32xf32>
    %cst_36 = arith.constant dense<0.000000e+00> : vector<2x32xf32>
    %96 = tpu.matmul %94, %95, %cst_36 {dimension_numbers = #tpu.dot_dimension_numbers<[1], [0], [0], [1], [0, 0, 1, 1], [], []>} : vector<2x32xf32>, vector<32x32xf32>, vector<2x32xf32> -> vector<2x32xf32>
    %c2 = arith.constant 2 : index
    %c0_37 = arith.constant 0 : index
    %97 = vector.load %arg5[%c2, %c0_37] : memref<18x32xf32, #tpu.memory_space<vmem>>, vector<2x32xf32>
    %cst_38 = arith.constant dense<0.000000e+00> : vector<2xf32>
    %98 = vector.multi_reduction <add>, %97, %cst_38 [1] : vector<2x32xf32> to vector<2xf32>
    %99 = vector.shape_cast %98 : vector<2xf32> to vector<2x1xf32>
    %cst_39 = arith.constant 3.200000e+01 : f32
    %100 = vector.broadcast %cst_39 : f32 to vector<2x1xf32>
    %101 = arith.divf %99, %100 : vector<2x1xf32>
    %102 = vector.broadcast %101 : vector<2x1xf32> to vector<2x32xf32>
    %103 = arith.subf %97, %102 : vector<2x32xf32>
    %104 = arith.mulf %103, %103 : vector<2x32xf32>
    %cst_40 = arith.constant dense<0.000000e+00> : vector<2xf32>
    %105 = vector.multi_reduction <add>, %104, %cst_40 [1] : vector<2x32xf32> to vector<2xf32>
    %106 = vector.shape_cast %105 : vector<2xf32> to vector<2x1xf32>
    %cst_41 = arith.constant 3.200000e+01 : f32
    %107 = vector.broadcast %cst_41 : f32 to vector<2x1xf32>
    %108 = arith.divf %106, %107 : vector<2x1xf32>
    %cst_42 = arith.constant 9.99999974E-6 : f32
    %109 = vector.broadcast %cst_42 : f32 to vector<2x1xf32>
    %110 = arith.addf %108, %109 : vector<2x1xf32>
    %111 = math.rsqrt %110 : vector<2x1xf32>
    %112 = vector.broadcast %111 : vector<2x1xf32> to vector<2x32xf32>
    %113 = arith.mulf %103, %112 : vector<2x32xf32>
    %114 = vector.broadcast %51 : vector<1x32xf32> to vector<2x32xf32>
    %115 = arith.mulf %113, %114 : vector<2x32xf32>
    %116 = vector.broadcast %52 : vector<1x32xf32> to vector<2x32xf32>
    %117 = arith.addf %115, %116 : vector<2x32xf32>
    %c256 = arith.constant 256 : index
    %c0_43 = arith.constant 0 : index
    %118 = vector.load %arg0[%c256, %c0_43] : memref<542x128xf32, #tpu.memory_space<vmem>>, vector<32x32xf32>
    %cst_44 = arith.constant dense<0.000000e+00> : vector<2x32xf32>
    %119 = tpu.matmul %117, %118, %cst_44 {dimension_numbers = #tpu.dot_dimension_numbers<[1], [0], [0], [1], [0, 0, 1, 1], [], []>} : vector<2x32xf32>, vector<32x32xf32>, vector<2x32xf32> -> vector<2x32xf32>
    %120 = arith.addf %96, %119 : vector<2x32xf32>
    %c4 = arith.constant 4 : index
    %c0_45 = arith.constant 0 : index
    %121 = vector.load %arg5[%c4, %c0_45] : memref<18x32xf32, #tpu.memory_space<vmem>>, vector<2x32xf32>
    %cst_46 = arith.constant dense<0.000000e+00> : vector<2xf32>
    %122 = vector.multi_reduction <add>, %121, %cst_46 [1] : vector<2x32xf32> to vector<2xf32>
    %123 = vector.shape_cast %122 : vector<2xf32> to vector<2x1xf32>
    %cst_47 = arith.constant 3.200000e+01 : f32
    %124 = vector.broadcast %cst_47 : f32 to vector<2x1xf32>
    %125 = arith.divf %123, %124 : vector<2x1xf32>
    %126 = vector.broadcast %125 : vector<2x1xf32> to vector<2x32xf32>
    %127 = arith.subf %121, %126 : vector<2x32xf32>
    %128 = arith.mulf %127, %127 : vector<2x32xf32>
    %cst_48 = arith.constant dense<0.000000e+00> : vector<2xf32>
    %129 = vector.multi_reduction <add>, %128, %cst_48 [1] : vector<2x32xf32> to vector<2xf32>
    %130 = vector.shape_cast %129 : vector<2xf32> to vector<2x1xf32>
    %cst_49 = arith.constant 3.200000e+01 : f32
    %131 = vector.broadcast %cst_49 : f32 to vector<2x1xf32>
    %132 = arith.divf %130, %131 : vector<2x1xf32>
    %cst_50 = arith.constant 9.99999974E-6 : f32
    %133 = vector.broadcast %cst_50 : f32 to vector<2x1xf32>
    %134 = arith.addf %132, %133 : vector<2x1xf32>
    %135 = math.rsqrt %134 : vector<2x1xf32>
    %136 = vector.broadcast %135 : vector<2x1xf32> to vector<2x32xf32>
    %137 = arith.mulf %127, %136 : vector<2x32xf32>
    %138 = vector.broadcast %51 : vector<1x32xf32> to vector<2x32xf32>
    %139 = arith.mulf %137, %138 : vector<2x32xf32>
    %140 = vector.broadcast %52 : vector<1x32xf32> to vector<2x32xf32>
    %141 = arith.addf %139, %140 : vector<2x32xf32>
    %c288 = arith.constant 288 : index
    %c0_51 = arith.constant 0 : index
    %142 = vector.load %arg0[%c288, %c0_51] : memref<542x128xf32, #tpu.memory_space<vmem>>, vector<32x32xf32>
    %cst_52 = arith.constant dense<0.000000e+00> : vector<2x32xf32>
    %143 = tpu.matmul %141, %142, %cst_52 {dimension_numbers = #tpu.dot_dimension_numbers<[1], [0], [0], [1], [0, 0, 1, 1], [], []>} : vector<2x32xf32>, vector<32x32xf32>, vector<2x32xf32> -> vector<2x32xf32>
    %144 = arith.addf %120, %143 : vector<2x32xf32>
    %c6 = arith.constant 6 : index
    %c0_53 = arith.constant 0 : index
    %145 = vector.load %arg5[%c6, %c0_53] : memref<18x32xf32, #tpu.memory_space<vmem>>, vector<2x32xf32>
    %cst_54 = arith.constant dense<0.000000e+00> : vector<2xf32>
    %146 = vector.multi_reduction <add>, %145, %cst_54 [1] : vector<2x32xf32> to vector<2xf32>
    %147 = vector.shape_cast %146 : vector<2xf32> to vector<2x1xf32>
    %cst_55 = arith.constant 3.200000e+01 : f32
    %148 = vector.broadcast %cst_55 : f32 to vector<2x1xf32>
    %149 = arith.divf %147, %148 : vector<2x1xf32>
    %150 = vector.broadcast %149 : vector<2x1xf32> to vector<2x32xf32>
    %151 = arith.subf %145, %150 : vector<2x32xf32>
    %152 = arith.mulf %151, %151 : vector<2x32xf32>
    %cst_56 = arith.constant dense<0.000000e+00> : vector<2xf32>
    %153 = vector.multi_reduction <add>, %152, %cst_56 [1] : vector<2x32xf32> to vector<2xf32>
    %154 = vector.shape_cast %153 : vector<2xf32> to vector<2x1xf32>
    %cst_57 = arith.constant 3.200000e+01 : f32
    %155 = vector.broadcast %cst_57 : f32 to vector<2x1xf32>
    %156 = arith.divf %154, %155 : vector<2x1xf32>
    %cst_58 = arith.constant 9.99999974E-6 : f32
    %157 = vector.broadcast %cst_58 : f32 to vector<2x1xf32>
    %158 = arith.addf %156, %157 : vector<2x1xf32>
    %159 = math.rsqrt %158 : vector<2x1xf32>
    %160 = vector.broadcast %159 : vector<2x1xf32> to vector<2x32xf32>
    %161 = arith.mulf %151, %160 : vector<2x32xf32>
    %162 = vector.broadcast %51 : vector<1x32xf32> to vector<2x32xf32>
    %163 = arith.mulf %161, %162 : vector<2x32xf32>
    %164 = vector.broadcast %52 : vector<1x32xf32> to vector<2x32xf32>
    %165 = arith.addf %163, %164 : vector<2x32xf32>
    %c320 = arith.constant 320 : index
    %c0_59 = arith.constant 0 : index
    %166 = vector.load %arg0[%c320, %c0_59] : memref<542x128xf32, #tpu.memory_space<vmem>>, vector<32x32xf32>
    %cst_60 = arith.constant dense<0.000000e+00> : vector<2x32xf32>
    %167 = tpu.matmul %165, %166, %cst_60 {dimension_numbers = #tpu.dot_dimension_numbers<[1], [0], [0], [1], [0, 0, 1, 1], [], []>} : vector<2x32xf32>, vector<32x32xf32>, vector<2x32xf32> -> vector<2x32xf32>
    %168 = arith.addf %144, %167 : vector<2x32xf32>
    %c8 = arith.constant 8 : index
    %c0_61 = arith.constant 0 : index
    %169 = vector.load %arg5[%c8, %c0_61] : memref<18x32xf32, #tpu.memory_space<vmem>>, vector<2x32xf32>
    %cst_62 = arith.constant dense<0.000000e+00> : vector<2xf32>
    %170 = vector.multi_reduction <add>, %169, %cst_62 [1] : vector<2x32xf32> to vector<2xf32>
    %171 = vector.shape_cast %170 : vector<2xf32> to vector<2x1xf32>
    %cst_63 = arith.constant 3.200000e+01 : f32
    %172 = vector.broadcast %cst_63 : f32 to vector<2x1xf32>
    %173 = arith.divf %171, %172 : vector<2x1xf32>
    %174 = vector.broadcast %173 : vector<2x1xf32> to vector<2x32xf32>
    %175 = arith.subf %169, %174 : vector<2x32xf32>
    %176 = arith.mulf %175, %175 : vector<2x32xf32>
    %cst_64 = arith.constant dense<0.000000e+00> : vector<2xf32>
    %177 = vector.multi_reduction <add>, %176, %cst_64 [1] : vector<2x32xf32> to vector<2xf32>
    %178 = vector.shape_cast %177 : vector<2xf32> to vector<2x1xf32>
    %cst_65 = arith.constant 3.200000e+01 : f32
    %179 = vector.broadcast %cst_65 : f32 to vector<2x1xf32>
    %180 = arith.divf %178, %179 : vector<2x1xf32>
    %cst_66 = arith.constant 9.99999974E-6 : f32
    %181 = vector.broadcast %cst_66 : f32 to vector<2x1xf32>
    %182 = arith.addf %180, %181 : vector<2x1xf32>
    %183 = math.rsqrt %182 : vector<2x1xf32>
    %184 = vector.broadcast %183 : vector<2x1xf32> to vector<2x32xf32>
    %185 = arith.mulf %175, %184 : vector<2x32xf32>
    %186 = vector.broadcast %51 : vector<1x32xf32> to vector<2x32xf32>
    %187 = arith.mulf %185, %186 : vector<2x32xf32>
    %188 = vector.broadcast %52 : vector<1x32xf32> to vector<2x32xf32>
    %189 = arith.addf %187, %188 : vector<2x32xf32>
    %c352 = arith.constant 352 : index
    %c0_67 = arith.constant 0 : index
    %190 = vector.load %arg0[%c352, %c0_67] : memref<542x128xf32, #tpu.memory_space<vmem>>, vector<32x32xf32>
    %cst_68 = arith.constant dense<0.000000e+00> : vector<2x32xf32>
    %191 = tpu.matmul %189, %190, %cst_68 {dimension_numbers = #tpu.dot_dimension_numbers<[1], [0], [0], [1], [0, 0, 1, 1], [], []>} : vector<2x32xf32>, vector<32x32xf32>, vector<2x32xf32> -> vector<2x32xf32>
    %192 = arith.addf %168, %191 : vector<2x32xf32>
    %c10 = arith.constant 10 : index
    %c0_69 = arith.constant 0 : index
    %193 = vector.load %arg5[%c10, %c0_69] : memref<18x32xf32, #tpu.memory_space<vmem>>, vector<2x32xf32>
    %cst_70 = arith.constant dense<0.000000e+00> : vector<2xf32>
    %194 = vector.multi_reduction <add>, %193, %cst_70 [1] : vector<2x32xf32> to vector<2xf32>
    %195 = vector.shape_cast %194 : vector<2xf32> to vector<2x1xf32>
    %cst_71 = arith.constant 3.200000e+01 : f32
    %196 = vector.broadcast %cst_71 : f32 to vector<2x1xf32>
    %197 = arith.divf %195, %196 : vector<2x1xf32>
    %198 = vector.broadcast %197 : vector<2x1xf32> to vector<2x32xf32>
    %199 = arith.subf %193, %198 : vector<2x32xf32>
    %200 = arith.mulf %199, %199 : vector<2x32xf32>
    %cst_72 = arith.constant dense<0.000000e+00> : vector<2xf32>
    %201 = vector.multi_reduction <add>, %200, %cst_72 [1] : vector<2x32xf32> to vector<2xf32>
    %202 = vector.shape_cast %201 : vector<2xf32> to vector<2x1xf32>
    %cst_73 = arith.constant 3.200000e+01 : f32
    %203 = vector.broadcast %cst_73 : f32 to vector<2x1xf32>
    %204 = arith.divf %202, %203 : vector<2x1xf32>
    %cst_74 = arith.constant 9.99999974E-6 : f32
    %205 = vector.broadcast %cst_74 : f32 to vector<2x1xf32>
    %206 = arith.addf %204, %205 : vector<2x1xf32>
    %207 = math.rsqrt %206 : vector<2x1xf32>
    %208 = vector.broadcast %207 : vector<2x1xf32> to vector<2x32xf32>
    %209 = arith.mulf %199, %208 : vector<2x32xf32>
    %210 = vector.broadcast %51 : vector<1x32xf32> to vector<2x32xf32>
    %211 = arith.mulf %209, %210 : vector<2x32xf32>
    %212 = vector.broadcast %52 : vector<1x32xf32> to vector<2x32xf32>
    %213 = arith.addf %211, %212 : vector<2x32xf32>
    %c384 = arith.constant 384 : index
    %c0_75 = arith.constant 0 : index
    %214 = vector.load %arg0[%c384, %c0_75] : memref<542x128xf32, #tpu.memory_space<vmem>>, vector<32x32xf32>
    %cst_76 = arith.constant dense<0.000000e+00> : vector<2x32xf32>
    %215 = tpu.matmul %213, %214, %cst_76 {dimension_numbers = #tpu.dot_dimension_numbers<[1], [0], [0], [1], [0, 0, 1, 1], [], []>} : vector<2x32xf32>, vector<32x32xf32>, vector<2x32xf32> -> vector<2x32xf32>
    %216 = arith.addf %192, %215 : vector<2x32xf32>
    %c12 = arith.constant 12 : index
    %c0_77 = arith.constant 0 : index
    %217 = vector.load %arg5[%c12, %c0_77] : memref<18x32xf32, #tpu.memory_space<vmem>>, vector<2x32xf32>
    %cst_78 = arith.constant dense<0.000000e+00> : vector<2xf32>
    %218 = vector.multi_reduction <add>, %217, %cst_78 [1] : vector<2x32xf32> to vector<2xf32>
    %219 = vector.shape_cast %218 : vector<2xf32> to vector<2x1xf32>
    %cst_79 = arith.constant 3.200000e+01 : f32
    %220 = vector.broadcast %cst_79 : f32 to vector<2x1xf32>
    %221 = arith.divf %219, %220 : vector<2x1xf32>
    %222 = vector.broadcast %221 : vector<2x1xf32> to vector<2x32xf32>
    %223 = arith.subf %217, %222 : vector<2x32xf32>
    %224 = arith.mulf %223, %223 : vector<2x32xf32>
    %cst_80 = arith.constant dense<0.000000e+00> : vector<2xf32>
    %225 = vector.multi_reduction <add>, %224, %cst_80 [1] : vector<2x32xf32> to vector<2xf32>
    %226 = vector.shape_cast %225 : vector<2xf32> to vector<2x1xf32>
    %cst_81 = arith.constant 3.200000e+01 : f32
    %227 = vector.broadcast %cst_81 : f32 to vector<2x1xf32>
    %228 = arith.divf %226, %227 : vector<2x1xf32>
    %cst_82 = arith.constant 9.99999974E-6 : f32
    %229 = vector.broadcast %cst_82 : f32 to vector<2x1xf32>
    %230 = arith.addf %228, %229 : vector<2x1xf32>
    %231 = math.rsqrt %230 : vector<2x1xf32>
    %232 = vector.broadcast %231 : vector<2x1xf32> to vector<2x32xf32>
    %233 = arith.mulf %223, %232 : vector<2x32xf32>
    %234 = vector.broadcast %51 : vector<1x32xf32> to vector<2x32xf32>
    %235 = arith.mulf %233, %234 : vector<2x32xf32>
    %236 = vector.broadcast %52 : vector<1x32xf32> to vector<2x32xf32>
    %237 = arith.addf %235, %236 : vector<2x32xf32>
    %c416 = arith.constant 416 : index
    %c0_83 = arith.constant 0 : index
    %238 = vector.load %arg0[%c416, %c0_83] : memref<542x128xf32, #tpu.memory_space<vmem>>, vector<32x32xf32>
    %cst_84 = arith.constant dense<0.000000e+00> : vector<2x32xf32>
    %239 = tpu.matmul %237, %238, %cst_84 {dimension_numbers = #tpu.dot_dimension_numbers<[1], [0], [0], [1], [0, 0, 1, 1], [], []>} : vector<2x32xf32>, vector<32x32xf32>, vector<2x32xf32> -> vector<2x32xf32>
    %240 = arith.addf %216, %239 : vector<2x32xf32>
    %c14 = arith.constant 14 : index
    %c0_85 = arith.constant 0 : index
    %241 = vector.load %arg5[%c14, %c0_85] : memref<18x32xf32, #tpu.memory_space<vmem>>, vector<2x32xf32>
    %cst_86 = arith.constant dense<0.000000e+00> : vector<2xf32>
    %242 = vector.multi_reduction <add>, %241, %cst_86 [1] : vector<2x32xf32> to vector<2xf32>
    %243 = vector.shape_cast %242 : vector<2xf32> to vector<2x1xf32>
    %cst_87 = arith.constant 3.200000e+01 : f32
    %244 = vector.broadcast %cst_87 : f32 to vector<2x1xf32>
    %245 = arith.divf %243, %244 : vector<2x1xf32>
    %246 = vector.broadcast %245 : vector<2x1xf32> to vector<2x32xf32>
    %247 = arith.subf %241, %246 : vector<2x32xf32>
    %248 = arith.mulf %247, %247 : vector<2x32xf32>
    %cst_88 = arith.constant dense<0.000000e+00> : vector<2xf32>
    %249 = vector.multi_reduction <add>, %248, %cst_88 [1] : vector<2x32xf32> to vector<2xf32>
    %250 = vector.shape_cast %249 : vector<2xf32> to vector<2x1xf32>
    %cst_89 = arith.constant 3.200000e+01 : f32
    %251 = vector.broadcast %cst_89 : f32 to vector<2x1xf32>
    %252 = arith.divf %250, %251 : vector<2x1xf32>
    %cst_90 = arith.constant 9.99999974E-6 : f32
    %253 = vector.broadcast %cst_90 : f32 to vector<2x1xf32>
    %254 = arith.addf %252, %253 : vector<2x1xf32>
    %255 = math.rsqrt %254 : vector<2x1xf32>
    %256 = vector.broadcast %255 : vector<2x1xf32> to vector<2x32xf32>
    %257 = arith.mulf %247, %256 : vector<2x32xf32>
    %258 = vector.broadcast %51 : vector<1x32xf32> to vector<2x32xf32>
    %259 = arith.mulf %257, %258 : vector<2x32xf32>
    %260 = vector.broadcast %52 : vector<1x32xf32> to vector<2x32xf32>
    %261 = arith.addf %259, %260 : vector<2x32xf32>
    %c448 = arith.constant 448 : index
    %c0_91 = arith.constant 0 : index
    %262 = vector.load %arg0[%c448, %c0_91] : memref<542x128xf32, #tpu.memory_space<vmem>>, vector<32x32xf32>
    %cst_92 = arith.constant dense<0.000000e+00> : vector<2x32xf32>
    %263 = tpu.matmul %261, %262, %cst_92 {dimension_numbers = #tpu.dot_dimension_numbers<[1], [0], [0], [1], [0, 0, 1, 1], [], []>} : vector<2x32xf32>, vector<32x32xf32>, vector<2x32xf32> -> vector<2x32xf32>
    %264 = arith.addf %240, %263 : vector<2x32xf32>
    %c16 = arith.constant 16 : index
    %c0_93 = arith.constant 0 : index
    %265 = vector.load %arg5[%c16, %c0_93] : memref<18x32xf32, #tpu.memory_space<vmem>>, vector<2x32xf32>
    %cst_94 = arith.constant dense<0.000000e+00> : vector<2xf32>
    %266 = vector.multi_reduction <add>, %265, %cst_94 [1] : vector<2x32xf32> to vector<2xf32>
    %267 = vector.shape_cast %266 : vector<2xf32> to vector<2x1xf32>
    %cst_95 = arith.constant 3.200000e+01 : f32
    %268 = vector.broadcast %cst_95 : f32 to vector<2x1xf32>
    %269 = arith.divf %267, %268 : vector<2x1xf32>
    %270 = vector.broadcast %269 : vector<2x1xf32> to vector<2x32xf32>
    %271 = arith.subf %265, %270 : vector<2x32xf32>
    %272 = arith.mulf %271, %271 : vector<2x32xf32>
    %cst_96 = arith.constant dense<0.000000e+00> : vector<2xf32>
    %273 = vector.multi_reduction <add>, %272, %cst_96 [1] : vector<2x32xf32> to vector<2xf32>
    %274 = vector.shape_cast %273 : vector<2xf32> to vector<2x1xf32>
    %cst_97 = arith.constant 3.200000e+01 : f32
    %275 = vector.broadcast %cst_97 : f32 to vector<2x1xf32>
    %276 = arith.divf %274, %275 : vector<2x1xf32>
    %cst_98 = arith.constant 9.99999974E-6 : f32
    %277 = vector.broadcast %cst_98 : f32 to vector<2x1xf32>
    %278 = arith.addf %276, %277 : vector<2x1xf32>
    %279 = math.rsqrt %278 : vector<2x1xf32>
    %280 = vector.broadcast %279 : vector<2x1xf32> to vector<2x32xf32>
    %281 = arith.mulf %271, %280 : vector<2x32xf32>
    %282 = vector.broadcast %51 : vector<1x32xf32> to vector<2x32xf32>
    %283 = arith.mulf %281, %282 : vector<2x32xf32>
    %284 = vector.broadcast %52 : vector<1x32xf32> to vector<2x32xf32>
    %285 = arith.addf %283, %284 : vector<2x32xf32>
    %c480 = arith.constant 480 : index
    %c0_99 = arith.constant 0 : index
    %286 = vector.load %arg0[%c480, %c0_99] : memref<542x128xf32, #tpu.memory_space<vmem>>, vector<32x32xf32>
    %cst_100 = arith.constant dense<0.000000e+00> : vector<2x32xf32>
    %287 = tpu.matmul %285, %286, %cst_100 {dimension_numbers = #tpu.dot_dimension_numbers<[1], [0], [0], [1], [0, 0, 1, 1], [], []>} : vector<2x32xf32>, vector<32x32xf32>, vector<2x32xf32> -> vector<2x32xf32>
    %288 = arith.addf %264, %287 : vector<2x32xf32>
    %c538 = arith.constant 538 : index
    %c0_101 = arith.constant 0 : index
    %289 = vector.load %arg0[%c538, %c0_101] : memref<542x128xf32, #tpu.memory_space<vmem>>, vector<1x32xf32>
    %290 = vector.broadcast %289 : vector<1x32xf32> to vector<2x32xf32>
    %291 = arith.addf %288, %290 : vector<2x32xf32>
    %c539 = arith.constant 539 : index
    %c0_102 = arith.constant 0 : index
    %292 = vector.load %arg0[%c539, %c0_102] : memref<542x128xf32, #tpu.memory_space<vmem>>, vector<1x32xf32>
    %c540 = arith.constant 540 : index
    %c0_103 = arith.constant 0 : index
    %293 = vector.load %arg0[%c540, %c0_103] : memref<542x128xf32, #tpu.memory_space<vmem>>, vector<1x32xf32>
    %cst_104 = arith.constant dense<0.000000e+00> : vector<2xf32>
    %294 = vector.multi_reduction <add>, %291, %cst_104 [1] : vector<2x32xf32> to vector<2xf32>
    %295 = vector.shape_cast %294 : vector<2xf32> to vector<2x1xf32>
    %cst_105 = arith.constant 3.200000e+01 : f32
    %296 = vector.broadcast %cst_105 : f32 to vector<2x1xf32>
    %297 = arith.divf %295, %296 : vector<2x1xf32>
    %298 = vector.broadcast %297 : vector<2x1xf32> to vector<2x32xf32>
    %299 = arith.subf %291, %298 : vector<2x32xf32>
    %300 = arith.mulf %299, %299 : vector<2x32xf32>
    %cst_106 = arith.constant dense<0.000000e+00> : vector<2xf32>
    %301 = vector.multi_reduction <add>, %300, %cst_106 [1] : vector<2x32xf32> to vector<2xf32>
    %302 = vector.shape_cast %301 : vector<2xf32> to vector<2x1xf32>
    %cst_107 = arith.constant 3.200000e+01 : f32
    %303 = vector.broadcast %cst_107 : f32 to vector<2x1xf32>
    %304 = arith.divf %302, %303 : vector<2x1xf32>
    %cst_108 = arith.constant 9.99999974E-6 : f32
    %305 = vector.broadcast %cst_108 : f32 to vector<2x1xf32>
    %306 = arith.addf %304, %305 : vector<2x1xf32>
    %307 = math.rsqrt %306 : vector<2x1xf32>
    %308 = vector.broadcast %307 : vector<2x1xf32> to vector<2x32xf32>
    %309 = arith.mulf %299, %308 : vector<2x32xf32>
    %310 = vector.broadcast %292 : vector<1x32xf32> to vector<2x32xf32>
    %311 = arith.mulf %309, %310 : vector<2x32xf32>
    %312 = vector.broadcast %293 : vector<1x32xf32> to vector<2x32xf32>
    %313 = arith.addf %311, %312 : vector<2x32xf32>
    %c0_109 = arith.constant 0 : index
    %c0_110 = arith.constant 0 : index
    %314 = vector.load %arg0[%c0_109, %c0_110] : memref<542x128xf32, #tpu.memory_space<vmem>>, vector<16x128xf32>
    %c16_111 = arith.constant 16 : index
    %c0_112 = arith.constant 0 : index
    %315 = vector.load %arg0[%c16_111, %c0_112] : memref<542x128xf32, #tpu.memory_space<vmem>>, vector<32x128xf32>
    %c48 = arith.constant 48 : index
    %c0_113 = arith.constant 0 : index
    %316 = vector.load %arg0[%c48, %c0_113] : memref<542x128xf32, #tpu.memory_space<vmem>>, vector<32x128xf32>
    %c530 = arith.constant 530 : index
    %c0_114 = arith.constant 0 : index
    %317 = vector.load %arg0[%c530, %c0_114] : memref<542x128xf32, #tpu.memory_space<vmem>>, vector<1x128xf32>
    %c512 = arith.constant 512 : index
    %c0_115 = arith.constant 0 : index
    %318 = vector.load %arg0[%c512, %c0_115] : memref<542x128xf32, #tpu.memory_space<vmem>>, vector<18x2xf32>
    %cst_116 = arith.constant dense<0.000000e+00> : vector<2x128xf32>
    %319 = tpu.matmul %50, %315, %cst_116 {dimension_numbers = #tpu.dot_dimension_numbers<[1], [0], [0], [1], [0, 0, 1, 1], [], []>} : vector<2x32xf32>, vector<32x128xf32>, vector<2x128xf32> -> vector<2x128xf32>
    %c0_117 = arith.constant 0 : index
    %c0_118 = arith.constant 0 : index
    %320 = vector.load %arg2[%c0_117, %c0_118] : memref<18x16xf32, #tpu.memory_space<vmem>>, vector<18x16xf32>
    %cst_119 = arith.constant dense<0.000000e+00> : vector<18x128xf32>
    %321 = tpu.matmul %320, %314, %cst_119 {dimension_numbers = #tpu.dot_dimension_numbers<[1], [0], [0], [1], [0, 0, 1, 1], [], []>} : vector<18x16xf32>, vector<16x128xf32>, vector<18x128xf32> -> vector<18x128xf32>
    %cst_120 = arith.constant dense<0.000000e+00> : vector<18x128xf32>
    %322 = tpu.matmul %318, %319, %cst_120 {dimension_numbers = #tpu.dot_dimension_numbers<[1], [0], [0], [1], [0, 0, 1, 1], [], []>} : vector<18x2xf32>, vector<2x128xf32>, vector<18x128xf32> -> vector<18x128xf32>
    %323 = arith.addf %321, %322 : vector<18x128xf32>
    %cst_121 = arith.constant dense<0.000000e+00> : vector<18x128xf32>
    %324 = tpu.matmul %73, %316, %cst_121 {dimension_numbers = #tpu.dot_dimension_numbers<[1], [0], [0], [1], [0, 0, 1, 1], [], []>} : vector<18x32xf32>, vector<32x128xf32>, vector<18x128xf32> -> vector<18x128xf32>
    %325 = arith.addf %323, %324 : vector<18x128xf32>
    %326 = vector.broadcast %317 : vector<1x128xf32> to vector<18x128xf32>
    %327 = arith.addf %325, %326 : vector<18x128xf32>
    %c0_122 = arith.constant 0 : index
    %c0_123 = arith.constant 0 : index
    %328 = vector.load %arg0[%c0_122, %c0_123] : memref<542x128xf32, #tpu.memory_space<vmem>>, vector<16x2xf32>
    %cst_124 = arith.constant dense<0.000000e+00> : vector<2x2xf32>
    %329 = tpu.matmul %27, %328, %cst_124 {dimension_numbers = #tpu.dot_dimension_numbers<[1], [0], [0], [1], [0, 0, 1, 1], [], []>} : vector<2x16xf32>, vector<16x2xf32>, vector<2x2xf32> -> vector<2x2xf32>
    %c48_125 = arith.constant 48 : index
    %c0_126 = arith.constant 0 : index
    %330 = vector.load %arg0[%c48_125, %c0_126] : memref<542x128xf32, #tpu.memory_space<vmem>>, vector<32x2xf32>
    %cst_127 = arith.constant dense<0.000000e+00> : vector<2x2xf32>
    %331 = tpu.matmul %313, %330, %cst_127 {dimension_numbers = #tpu.dot_dimension_numbers<[1], [0], [0], [1], [0, 0, 1, 1], [], []>} : vector<2x32xf32>, vector<32x2xf32>, vector<2x2xf32> -> vector<2x2xf32>
    %332 = arith.addf %329, %331 : vector<2x2xf32>
    %333 = vector.extract_strided_slice %319 {offsets = [0, 0], sizes = [2, 2], strides = [1, 1]} : vector<2x128xf32> to vector<2x2xf32>
    %334 = arith.addf %332, %333 : vector<2x2xf32>
    %335 = vector.extract_strided_slice %317 {offsets = [0, 0], sizes = [1, 2], strides = [1, 1]} : vector<1x128xf32> to vector<1x2xf32>
    %336 = vector.broadcast %335 : vector<1x2xf32> to vector<2x2xf32>
    %337 = arith.addf %334, %336 : vector<2x2xf32>
    %c0_128 = arith.constant 0 : index
    %c0_129 = arith.constant 0 : index
    %338 = vector.load %arg6[%c0_128, %c0_129] : memref<2x2xf32, #tpu.memory_space<vmem>>, vector<2x2xf32>
    %339 = arith.subf %337, %338 : vector<2x2xf32>
    %340 = arith.mulf %339, %339 : vector<2x2xf32>
    %341 = vector.shape_cast %340 : vector<2x2xf32> to vector<1x2x2xf32>
    %cst_130 = arith.constant dense<0.000000e+00> : vector<1xf32>
    %342 = vector.multi_reduction <add>, %341, %cst_130 [1, 2] : vector<1x2x2xf32> to vector<1xf32>
    %343 = vector.shape_cast %342 : vector<1xf32> to vector<1x1x1xf32>
    %344 = vector.extract %343[0, 0, 0] : f32 from vector<1x1x1xf32>
    %345 = vector.broadcast %344 : f32 to vector<1x1xf32>
    %cst_131 = arith.constant 4.000000e+00 : f32
    %346 = vector.broadcast %cst_131 : f32 to vector<1x1xf32>
    %347 = arith.divf %345, %346 : vector<1x1xf32>
    %348 = vector.extract_strided_slice %327 {offsets = [0, 2], sizes = [18, 2], strides = [1, 1]} : vector<18x128xf32> to vector<18x2xf32>
    %c0_132 = arith.constant 0 : index
    %c0_133 = arith.constant 0 : index
    %349 = vector.load %arg7[%c0_132, %c0_133] : memref<18x2xf32, #tpu.memory_space<vmem>>, vector<18x2xf32>
    %350 = arith.subf %348, %349 : vector<18x2xf32>
    %351 = arith.mulf %350, %350 : vector<18x2xf32>
    %352 = vector.shape_cast %351 : vector<18x2xf32> to vector<1x18x2xf32>
    %cst_134 = arith.constant dense<0.000000e+00> : vector<1xf32>
    %353 = vector.multi_reduction <add>, %352, %cst_134 [1, 2] : vector<1x18x2xf32> to vector<1xf32>
    %354 = vector.shape_cast %353 : vector<1xf32> to vector<1x1x1xf32>
    %355 = vector.extract %354[0, 0, 0] : f32 from vector<1x1x1xf32>
    %356 = vector.broadcast %355 : f32 to vector<1x1xf32>
    %cst_135 = arith.constant 3.600000e+01 : f32
    %357 = vector.broadcast %cst_135 : f32 to vector<1x1xf32>
    %358 = arith.divf %356, %357 : vector<1x1xf32>
    %359 = vector.extract_strided_slice %327 {offsets = [0, 4], sizes = [18, 2], strides = [1, 1]} : vector<18x128xf32> to vector<18x2xf32>
    %cst_136 = arith.constant dense<0xFF800000> : vector<18xf32>
    %360 = vector.multi_reduction <maximumf>, %359, %cst_136 [1] : vector<18x2xf32> to vector<18xf32>
    %361 = vector.shape_cast %360 : vector<18xf32> to vector<18x1xf32>
    %362 = vector.broadcast %361 : vector<18x1xf32> to vector<18x2xf32>
    %363 = arith.subf %359, %362 : vector<18x2xf32>
    %364 = math.exp %363 : vector<18x2xf32>
    %cst_137 = arith.constant dense<0.000000e+00> : vector<18xf32>
    %365 = vector.multi_reduction <add>, %364, %cst_137 [1] : vector<18x2xf32> to vector<18xf32>
    %366 = vector.shape_cast %365 : vector<18xf32> to vector<18x1xf32>
    %367 = math.log %366 : vector<18x1xf32>
    %368 = arith.addf %361, %367 : vector<18x1xf32>
    %c541 = arith.constant 541 : index
    %c0_138 = arith.constant 0 : index
    %369 = vector.load %arg0[%c541, %c0_138] : memref<542x128xf32, #tpu.memory_space<vmem>>, vector<1x2xf32>
    %c0_139 = arith.constant 0 : index
    %c0_140 = arith.constant 0 : index
    %370 = vector.load %arg8[%c0_139, %c0_140] : memref<18x1xf32, #tpu.memory_space<vmem>>, vector<18x1xf32>
    %371 = vector.broadcast %370 : vector<18x1xf32> to vector<18x2xf32>
    %372 = vector.broadcast %369 : vector<1x2xf32> to vector<18x2xf32>
    %373 = arith.cmpf oeq, %371, %372 : vector<18x2xf32>
    %374 = arith.extui %373 : vector<18x2xi1> to vector<18x2xi32>
    %375 = arith.sitofp %374 : vector<18x2xi32> to vector<18x2xf32>
    %376 = arith.mulf %375, %359 : vector<18x2xf32>
    %cst_141 = arith.constant dense<0.000000e+00> : vector<18xf32>
    %377 = vector.multi_reduction <add>, %376, %cst_141 [1] : vector<18x2xf32> to vector<18xf32>
    %378 = vector.shape_cast %377 : vector<18xf32> to vector<18x1xf32>
    %379 = arith.subf %368, %378 : vector<18x1xf32>
    %380 = vector.shape_cast %379 : vector<18x1xf32> to vector<1x18x1xf32>
    %cst_142 = arith.constant dense<0.000000e+00> : vector<1xf32>
    %381 = vector.multi_reduction <add>, %380, %cst_142 [1, 2] : vector<1x18x1xf32> to vector<1xf32>
    %382 = vector.shape_cast %381 : vector<1xf32> to vector<1x1x1xf32>
    %383 = vector.extract %382[0, 0, 0] : f32 from vector<1x1x1xf32>
    %384 = vector.broadcast %383 : f32 to vector<1x1xf32>
    %cst_143 = arith.constant 1.800000e+01 : f32
    %385 = vector.broadcast %cst_143 : f32 to vector<1x1xf32>
    %386 = arith.divf %384, %385 : vector<1x1xf32>
    %c0_144 = arith.constant 0 : index
    %c0_145 = arith.constant 0 : index
    %387 = vector.load %arg9[%c0_144, %c0_145] : memref<18x128xf32, #tpu.memory_space<vmem>>, vector<18x128xf32>
    tpu.vector_store %arg9[%c0_144, %c0_145], %327 {strides = array<i32>} : memref<18x128xf32, #tpu.memory_space<vmem>>, vector<18x128xf32>,
    %c0_146 = arith.constant 0 : index
    %c0_147 = arith.constant 0 : index
    %388 = vector.load %arg9[%c0_146, %c0_147] : memref<18x128xf32, #tpu.memory_space<vmem>>, vector<2x2xf32>
    tpu.vector_store %arg9[%c0_146, %c0_147], %337 {strides = array<i32>} : memref<18x128xf32, #tpu.memory_space<vmem>>, vector<2x2xf32>,
    %c0_148 = arith.constant 0 : index
    %c6_149 = arith.constant 6 : index
    %389 = vector.load %arg9[%c0_148, %c6_149] : memref<18x128xf32, #tpu.memory_space<vmem>>, vector<1x1xf32>
    tpu.vector_store %arg9[%c0_148, %c6_149], %347 {strides = array<i32>} : memref<18x128xf32, #tpu.memory_space<vmem>>, vector<1x1xf32>,
    %c0_150 = arith.constant 0 : index
    %c7 = arith.constant 7 : index
    %390 = vector.load %arg9[%c0_150, %c7] : memref<18x128xf32, #tpu.memory_space<vmem>>, vector<1x1xf32>
    tpu.vector_store %arg9[%c0_150, %c7], %358 {strides = array<i32>} : memref<18x128xf32, #tpu.memory_space<vmem>>, vector<1x1xf32>,
    %c0_151 = arith.constant 0 : index
    %c8_152 = arith.constant 8 : index
    %391 = vector.load %arg9[%c0_151, %c8_152] : memref<18x128xf32, #tpu.memory_space<vmem>>, vector<1x1xf32>
    tpu.vector_store %arg9[%c0_151, %c8_152], %386 {strides = array<i32>} : memref<18x128xf32, #tpu.memory_space<vmem>>, vector<1x1xf32>,
    return
  }
}

</mosaic_0001>

<bundles_post_ra>
// kernel: model_finetuner_forward.1
= control target key start
LH: loop header
LB: loop body
LE: loop exit
PB: predicated region body
PF: predicated region fallthrough
CT: control target
= control target key end

     0   :  { %14 = vsyncpa [#allocation3], 0  ;;  %s2343_s30 = smov [#allocation2]   ;;  %s2865_s0 = inlined_call_operand.hbm [shape: f32[542,128], index: 0, kind: input, shape index: {}]   ;;  %s2866_s1 = inlined_call_operand.vmem [shape: f32[2,144], index: 1, kind: input, shape index: {}]   ;;  %s2867_s2 = inlined_call_operand.vmem [shape: f32[18,16], index: 2, kind: input, shape index: {}]   ;;  %s2868_s3 = inlined_call_operand.vmem [shape: f32[2,32], index: 3, kind: input, shape index: {}]   ;;  %s2869_s4 = inlined_call_operand.vmem [shape: f32[18,32], index: 4, kind: input, shape index: {}]   ;;  %s2870_s5 = inlined_call_operand.vmem [shape: f32[18,32], index: 5, kind: input, shape index: {}]   ;;  %s2871_s6 = inlined_call_operand.vmem [shape: f32[2,2], index: 6, kind: input, shape index: {}]   ;;  %s2872_s7 = inlined_call_operand.vmem [shape: f32[18,2], index: 7, kind: input, shape index: {}]   ;;  %s2873_s8 = inlined_call_operand.vmem [shape: f32[18,1], index: 8, kind: input, shape index: {}]   ;;  %s2874_s9 = inlined_call_operand.vmem [shape: f32[18,128], index: 9, kind: output, shape index: {}]  }
   0x1   :  { %s20_s10 = sshll.u32 %s2343_s30, 4  ;;  %s2319_s13 = scalar_lea.hbm %s2865_s0, 8704  ;;  %s21_s10 = int_to_ptr.vmem [resolvable:$true] %s20_s10 }
   0x2   :  { %p2320_p0 = scmp.ne.s32.totalorder %s2865_s0, %s2319_s13  ;;  %p2323_p1 = scmp.lt.u32.totalorder %s2319_s13, %s2865_s0 }
   0x4   :  { %p2325_p2 = pnand %p2323_p1, %p2320_p0 }
   0x6   :  { %2328 = shalt.err (!%p2325_p2)
}
   0x7   :  { %s2329_s18 = scalar_lea.vmem %s21_s10, 8704  ;;  %p2334_p4 = scmp.lt.s32.totalorder %s21_s10, %s21_s10 }
   0x8   :  { %p2330_p3 = scmp.ne.s32.totalorder %s21_s10, %s2329_s18  ;;  %p2335_p5 = scmp.lt.s32.totalorder %s2329_s18, %s2329_s18 }
   0xa   :  { %p2336_p6 = por %p2335_p5, %p2334_p4 }
   0xc   :  { %p2337_p7 = pnand %p2336_p6, %p2330_p3 }
   0xe   :  { %2340 = shalt.err (!%p2337_p7)
}
   0xf   :  { %s2344_s19 = smov 128   ;;  %s2345_s20 = smov 8  }
  0x10   :  { %26 = dma.hbm_to_vmem [thread:$0]  %s2865_s0, 8704, %s21_s10, [#allocation3], %s2344_s19, %s2344_s19, %s2345_s20  }
  0x11   :  { %2341 = dma.done.wait [#allocation3], 8704  }
  0x12   :  { %2342 = vsyncadd [#allocation3], 4294958592  ;;  %v2346_v0 = vmov 0.0|0.0   ;;  %vm183_vm0 = vcmask 254976   ;;  %v2420_v1 = vld [vmem:[%s2870_s5 + $0xa] sm:$0x3] }
  0x13   :  { %2154 = vmatprep.subr.bf16.mxu0 %v2346_v0  ;;  %2181 = vmatprep.subr.bf16.mxu1 %v2346_v0  ;;  %v2425_v2 = vld [vmem:[%s2868_s3] sm:$0x3]  ;;  %v2430_v3 = vld [vmem:[%s2870_s5 + $0xe] sm:$0x3]  ;;  %v736_v4 = vsel %vm183_vm0, %v2420_v1, 0.0  ;;  %v46_v6 = vld [vmem:[#allocation2 + $0x50] sm:$0xff] }
  0x14   :  { %v184_v5 = vsel %vm183_vm0, %v2425_v2, 0.0  ;;  %737 = vadd.xlane.f32.xlu0 %v736_v4  ;;  %v2439_v7 = vld [vmem:[%s2870_s5 + $0x2] sm:$0x3]  ;;  %v47_v8 = vld [vmem:[#allocation2 + $0x58] sm:$0xff]  ;;  %v924_v9 = vsel %vm183_vm0, %v2430_v3, 0.0  ;;  %v49_v15 = vld [vmem:[#allocation2 + $0x68] sm:$0xff] }
  0x15   :  { %185 = vadd.xlane.f32.xlu1 %v184_v5  ;;  %v288_v10 = vsel %vm183_vm0, %v2439_v7, 0.0  ;;  %v2155_v11 = vpack.c.bf16 %v47_v8, %v46_v6  ;;  %v2448_v12 = vld [vmem:[%s2870_s5] sm:$0x3]  ;;  %v2453_v13 = vld [vmem:[%s2870_s5 + $0x4] sm:$0x3]  ;;  %v50_v17 = vld [vmem:[#allocation2 + $0x70] sm:$0xff] }
  0x16   :  { %v48_v14 = vld [vmem:[#allocation2 + $0x60] sm:$0xff]  ;;  %v51_v18 = vld [vmem:[#allocation2 + $0x78] sm:$0xff]  ;;  %v268_v19 = vsel %vm183_vm0, %v2448_v12, 0.0  ;;  %v454_v20 = vsel %vm183_vm0, %v2453_v13, 0.0  ;;  %v2468_v22 = vld [vmem:[%s2870_s5 + $0x8] sm:$0x3] }
  0x17   :  { %2156 = vmatpush1.bf16.msra.mxu0 %v2155_v11  ;;  %v2158_v16 = vpack.c.bf16 %v49_v15, %v48_v14  ;;  %v2463_v21 = vld [vmem:[%s2870_s5 + $0x6] sm:$0x3]  ;;  %v2161_v23 = vpack.c.bf16 %v51_v18, %v50_v17  ;;  %vm80_vm1 = vcmask 130048   ;;  %v53_v25 = vld [vmem:[#allocation2 + $0x88] sm:$0xff]  ;;  %v642_v28 = vsel %vm183_vm0, %v2468_v22, 0.0  ;;  %v54_v32 = vld [vmem:[#allocation2 + $0x90] sm:$0xff] }
  0x18   :  { %925 = vadd.xlane.f32.xlu0 %v924_v9  ;;  %2157 = vmatprep.subr.bf16.mxu0 %v2346_v0  ;;  %v52_v24 = vld [vmem:[#allocation2 + $0x80] sm:$0xff]  ;;  %v548_v27 = vsel %vm183_vm0, %v2463_v21, 0.0  ;;  %v2481_v30 = vld [vmem:[%s2870_s5 + $0xc] sm:$0x3]  ;;  %v55_v33 = vld [vmem:[#allocation2 + $0x98] sm:$0xff]  ;;  %vm213_vm2 = vcmask 261120  }
  0x19   :  { %289 = vadd.xlane.f32.xlu1 %v288_v10  ;;  %v1873_v26 = vld.sshfl [vmem:[%s2866_s1] sm:$0x33 pattern:$0x76325410]  ;;  %v2164_v31 = vpack.c.bf16 %v53_v25, %v52_v24  ;;  %v830_v34 = vsel %vm183_vm0, %v2481_v30, 0.0  ;;  %v2167_v36 = vpack.c.bf16 %v55_v33, %v54_v32  ;;  %v57_v38 = vld [vmem:[#allocation2 + $0xa8] sm:$0xff] }
  0x1a   :  { %v78_v29 = vcombine.high %v1873_v26, %v1873_v26  ;;  %v2490_v35 = vld [vmem:[%s2870_s5 + $0x10] sm:$0x3]  ;;  %v56_v37 = vld [vmem:[#allocation2 + $0xa0] sm:$0xff]  ;;  %v59_v42 = vld [vmem:[#allocation2 + $0xb8] sm:$0xff]  ;;  %vm2347_vm3 = vmmov 0   ;;  %vm155_vm4 = vcmask 123904  }
  0x1b   :  { %2159 = vmatpush1.bf16.msra.mxu0 %v2158_v16  ;;  %v1018_v39 = vsel %vm183_vm0, %v2490_v35, 0.0  ;;  %v2170_v40 = vpack.c.bf16 %v57_v38, %v56_v37  ;;  %v58_v41 = vld [vmem:[#allocation2 + $0xb0] sm:$0xff]  ;;  %v60_v44 = vld [vmem:[#allocation2 + $0xc0] sm:$0xff]  ;;  %v61_v45 = vld [vmem:[#allocation2 + $0xc8] sm:$0xff]  ;;  %vm1242_vm5 = vcmask 1041408   ;;  %vm1232_vm6 = vcmask 15360  }
  0x1c   :  { %269 = vadd.xlane.f32.xlu0 %v268_v19  ;;  %2160 = vmatprep.subr.bf16.mxu0 %v2346_v0  ;;  %v2173_v43 = vpack.c.bf16 %v59_v42, %v58_v41  ;;  %v2176_v46 = vpack.c.bf16 %v61_v45, %v60_v44  ;;  %v62_v47 = vld [vmem:[#allocation2 + $0xd0] sm:$0xff]  ;;  %v63_v48 = vld [vmem:[#allocation2 + $0xd8] sm:$0xff]  ;;  %v752_v44 = vld [vmem:[#allocation2 + $0x188] sm:$0xff]  ;;  %vm1729_vm7 = vcmask 48160   ;;  %vm1736_vm8 = vcmask 42016   ;;  %s2350_s13 = smov 124  }
  0x1d   :  { %455 = vadd.xlane.f32.xlu1 %v454_v20  ;;  %1874 = vmatprep.mubr.msk.f32.mxu0 %vm80_vm1, %v78_v29  ;;  %v2179_v49 = vpack.c.bf16 %v63_v48, %v62_v47  ;;  %v754_v47 = vld [vmem:[#allocation2 + $0x198] sm:$0xff]  ;;  %s2351_s5 = smov 2   ;;  %vm1665_vm11 = vcmask 9216   ;;  %vm1838_vm13 = vcmask 7168   ;;  %vm1842_vm14 = vcmask 1024  }
  0x1e   :  { %vm1861_vm15 = vcmask 49200  }
  0x1f   :  { %2162 = vmatpush1.bf16.msra.mxu0 %v2161_v23 }
  0x20   :  { %549 = vadd.xlane.f32.xlu0 %v548_v27  ;;  %2163 = vmatprep.subr.bf16.mxu0 %v2346_v0 }
  0x21   :  { %643 = vadd.xlane.f32.xlu1 %v642_v28 }
  0x23   :  { %2165 = vmatpush1.bf16.msra.mxu0 %v2164_v31 }
  0x24   :  { %831 = vadd.xlane.f32.xlu0 %v830_v34  ;;  %2166 = vmatprep.subr.bf16.mxu0 %v2346_v0  ;;  %v2556_v34 = vld [vmem:[%s2869_s4] sm:$0xff] }
  0x25   :  { %v214_v37 = vsel %vm213_vm2, %v2556_v34, 0.0 }
  0x27   :  { %2168 = vmatpush1.bf16.msra.mxu0 %v2167_v36 }
  0x28   :  { %1019 = vadd.xlane.f32.xlu0 %v1018_v39  ;;  %2169 = vmatprep.subr.bf16.mxu0 %v2346_v0  ;;  %v2569_v39 = vld [vmem:[%s2869_s4 + $0x10] sm:$0x3] }
  0x29   :  { %v220_v41 = vsel %vm183_vm0, %v2569_v39, 0.0 }
  0x2b   :  { %2171 = vmatpush1.bf16.msra.mxu0 %v2170_v40 }
  0x2c   :  { %2172 = vmatprep.subr.bf16.mxu0 %v2346_v0 }
  0x2f   :  { %2174 = vmatpush1.bf16.msra.mxu0 %v2173_v43  ;;  %v751_v43 = vld [vmem:[#allocation2 + $0x180] sm:$0xff] }
  0x30   :  { %2175 = vmatprep.subr.bf16.mxu0 %v2346_v0  ;;  %v2212_v45 = vpack.c.bf16 %v752_v44, %v751_v43  ;;  %v941_v43 = vld [vmem:[#allocation2 + $0x1d0] sm:$0xff] }
  0x33   :  { %2177 = vmatpush1.bf16.msra.mxu0 %v2176_v46  ;;  %v753_v46 = vld [vmem:[#allocation2 + $0x190] sm:$0xff] }
  0x34   :  { %2178 = vmatprep.subr.bf16.mxu0 %v2346_v0  ;;  %v2215_v48 = vpack.c.bf16 %v754_v47, %v753_v46 }
  0x37   :  { %2180 = vmatpush1.bf16.msra.mxu0 %v2179_v49  ;;  %v303_v49 = vld [vmem:[#allocation2 + $0x100] sm:$0xff] }
  0x38   :  { %2211 = vmatprep.subr.bf16.mxu0 %v2346_v0 }
  0x3a   :  { %148 = vmatmul.mubr.f32.vlgmr.msra.gmra.mrb[0].mxu0 %v1873_v26 }
  0x3b   :  { %2213 = vmatpush3.bf16.msra.mxu0 %v2212_v45 }
  0x3c   :  { %2214 = vmatprep.subr.bf16.mxu0 %v2346_v0 }
  0x3f   :  { %2216 = vmatpush3.bf16.msra.mxu0 %v2215_v48 }
  0x40   :  { %2223 = vmatprep.subr.bf16.mxu0 %v2346_v0 }
  0xa1   :  { %v738_v50 = vpop.xlane.xlu0 %737 }
  0xa2   :  { %v186_v51 = vpop.xlane.xlu1 %185  ;;  %v739_v52 = vmul.f32 0.03125, %v738_v50  ;;  %v304_v50 = vld [vmem:[#allocation2 + $0x108] sm:$0xff] }
  0xa3   :  { %v188_v53 = vmul.f32 0.03125, %v186_v51  ;;  %v2182_v51 = vpack.c.bf16 %v304_v50, %v303_v49 }
  0xa4   :  { %v2501_v54 = vsub.f32 %v2420_v1, %v739_v52  ;;  %v2348_v52 = vmov 0.0  }
  0xa5   :  { %v2504_v55 = vsub.f32 %v2425_v2, %v188_v53  ;;  %v926_v56 = vpop.xlane.xlu0 %925  ;;  %2048 = vmatprep.mubr.msk.f32.mxu0 %vm2347_vm3, %v2348_v52  ;;  %1993 = vmatprep.mubr.msk.f32.mxu1 %vm2347_vm3, %v2348_v52  ;;  %v305_v53 = vld [vmem:[#allocation2 + $0x110] sm:$0xff] }
  0xa6   :  { %v290_v57 = vpop.xlane.xlu1 %289  ;;  %v927_v58 = vmul.f32 0.03125, %v926_v56  ;;  %v741_v59 = vmul.f32 %v2501_v54, %v2501_v54  ;;  %2183 = vmatpush3.bf16.msra.mxu1 %v2182_v51  ;;  %v306_v56 = vld [vmem:[#allocation2 + $0x118] sm:$0xff] }
  0xa7   :  { %v190_v60 = vmul.f32 %v2504_v55, %v2504_v55  ;;  %v291_v61 = vmul.f32 0.03125, %v290_v57  ;;  %2184 = vmatprep.subr.bf16.mxu1 %v2346_v0  ;;  %v2185_v57 = vpack.c.bf16 %v306_v56, %v305_v53  ;;  %v284_v56 = vld [vmem:[#allocation2 + $0xe8] sm:$0xff] }
  0xa8   :  { %v2511_v62 = vsub.f32 %v2430_v3, %v927_v58  ;;  %v742_v63 = vsel %vm183_vm0, %v741_v59, 0.0 }
  0xa9   :  { %v191_v1 = vsel %vm183_vm0, %v190_v60, 0.0  ;;  %v2516_v2 = vsub.f32 %v2439_v7, %v291_v61  ;;  %v270_v4 = vpop.xlane.xlu0 %269  ;;  %743 = vadd.xlane.f32.xlu1 %v742_v63 }
  0xaa   :  { %192 = vadd.xlane.f32.xlu0 %v191_v1  ;;  %v456_v5 = vpop.xlane.xlu1 %455  ;;  %v271_v6 = vmul.f32 0.03125, %v270_v4  ;;  %v929_v8 = vmul.f32 %v2511_v62, %v2511_v62  ;;  %2186 = vmatpush3.bf16.msra.mxu1 %v2185_v57  ;;  %v1144_v57 = vld [vmem:[#allocation2 + $0x10] sm:$0xff] }
  0xab   :  { %v457_v9 = vmul.f32 0.03125, %v456_v5  ;;  %v293_v3 = vmul.f32 %v2516_v2, %v2516_v2  ;;  %2187 = vmatprep.subr.bf16.mxu1 %v2346_v0 }
  0xac   :  { %v2523_v10 = vsub.f32 %v2448_v12, %v271_v6  ;;  %v930_v11 = vsel %vm183_vm0, %v929_v8, 0.0 }
  0xad   :  { %v2527_v7 = vsub.f32 %v2453_v13, %v457_v9  ;;  %v550_v14 = vpop.xlane.xlu0 %549  ;;  %931 = vadd.xlane.f32.xlu1 %v930_v11  ;;  %v294_v15 = vsel %vm183_vm0, %v293_v3, 0.0 }
  0xae   :  { %v644_v16 = vpop.xlane.xlu1 %643  ;;  %v551_v17 = vmul.f32 0.03125, %v550_v14  ;;  %v273_v18 = vmul.f32 %v2523_v10, %v2523_v10 }
  0xaf   :  { %v645_v19 = vmul.f32 0.03125, %v644_v16  ;;  %v459_v20 = vmul.f32 %v2527_v7, %v2527_v7 }
  0xb0   :  { %v2535_v12 = vsub.f32 %v2463_v21, %v551_v17  ;;  %v274_v23 = vsel %vm183_vm0, %v273_v18, 0.0 }
  0xb1   :  { %v2539_v13 = vsub.f32 %v2468_v22, %v645_v19  ;;  %v832_v24 = vpop.xlane.xlu0 %831  ;;  %275 = vadd.xlane.f32.xlu0 %v274_v23  ;;  %295 = vadd.xlane.f32.xlu1 %v294_v15  ;;  %v460_v27 = vsel %vm183_vm0, %v459_v20, 0.0 }
  0xb2   :  { %v833_v25 = vmul.f32 0.03125, %v832_v24  ;;  %v553_v26 = vmul.f32 %v2535_v12, %v2535_v12 }
  0xb3   :  { %v647_v28 = vmul.f32 %v2539_v13, %v2539_v13 }
  0xb4   :  { %v2547_v21 = vsub.f32 %v2481_v30, %v833_v25  ;;  %v554_v29 = vsel %vm183_vm0, %v553_v26, 0.0  ;;  %v2595_v26 = vld [vmem:[#allocation2 + $0x218] ss:$0 sm:$0xff] }
  0xb5   :  { %v1020_v31 = vpop.xlane.xlu0 %1019  ;;  %555 = vadd.xlane.f32.xlu0 %v554_v29  ;;  %461 = vadd.xlane.f32.xlu1 %v460_v27  ;;  %v648_v33 = vsel %vm183_vm0, %v647_v28, 0.0  ;;  %v939_v28 = vld [vmem:[#allocation2 + $0x1c0] sm:$0xff]  ;;  %v940_v29 = vld [vmem:[#allocation2 + $0x1c8] sm:$0xff] }
  0xb6   :  { %v1021_v22 = vmul.f32 0.03125, %v1020_v31  ;;  %v835_v32 = vmul.f32 %v2547_v21, %v2547_v21  ;;  %v2598_v31 = vld [vmem:[#allocation2 + $0x219] ss:$0 sm:$0xff] }
  0xb8   :  { %v2559_v30 = vsub.f32 %v2490_v35, %v1021_v22  ;;  %v836_v36 = vsel %vm183_vm0, %v835_v32, 0.0  ;;  %v2574_v35 = vld [vmem:[%s2869_s4 + $0x8] sm:$0xff] }
  0xb9   :  { %837 = vadd.xlane.f32.xlu0 %v836_v36  ;;  %649 = vadd.xlane.f32.xlu1 %v648_v33  ;;  %v217_v42 = vsel %vm213_vm2, %v2574_v35, 0.0 }
  0xba   :  { %v1023_v38 = vmul.f32 %v2559_v30, %v2559_v30 }
  0xbc   :  { %v1024_v40 = vsel %vm183_vm0, %v1023_v38, 0.0  ;;  %v2224_v38 = vpack.c.bf16 %v940_v29, %v939_v28 }
  0xbd   :  { %215 = vadd.xlane.f32.xlu0 %v214_v37  ;;  %1025 = vadd.xlane.f32.xlu1 %v1024_v40 }
  0xc1   :  { %221 = vadd.xlane.f32.xlu0 %v220_v41  ;;  %218 = vadd.xlane.f32.xlu1 %v217_v42 }
 0x10d   :  { %v2589_v58 = vpop.f32.mrb[0].mxu0 }
 0x10e   :  { %v151_v59 = vpop.f32.mrb[1].mxu0 }
 0x10f   :  { %v1145_v59 = vld [vmem:[#allocation2 + $0x18] sm:$0xff] }
 0x136   :  { %v744_v60 = vpop.xlane.xlu1 %743 }
 0x137   :  { %v745_v61 = vmul.f32 0.03125, %v744_v60  ;;  %v193_v1 = vpop.xlane.xlu0 %192 }
 0x138   :  { %v194_v8 = vmul.f32 0.03125, %v193_v1 }
 0x139   :  { %v746_v63 = vadd.f32 1e-05, %v745_v61 }
 0x13a   :  { %v932_v4 = vpop.xlane.xlu1 %931  ;;  %v195_v16 = vadd.f32 1e-05, %v194_v8 }
 0x13b   :  { %v933_v5 = vmul.f32 0.03125, %v932_v4  ;;  %2277 = vrsqrt.f32 %v746_v63 }
 0x13d   :  { %v934_v6 = vadd.f32 1e-05, %v933_v5 }
 0x13e   :  { %v276_v9 = vpop.xlane.xlu0 %275  ;;  %v296_v3 = vpop.xlane.xlu1 %295 }
 0x13f   :  { %2279 = vrsqrt.f32 %v934_v6  ;;  %v277_v11 = vmul.f32 0.03125, %v276_v9  ;;  %v297_v14 = vmul.f32 0.03125, %v296_v3  ;;  %v1872_v6 = vld [vmem:[#allocation2 + $0x213] ss:$0 sm:$0xff] }
 0x141   :  { %v298_v15 = vadd.f32 1e-05, %v297_v14  ;;  %v278_v19 = vadd.f32 1e-05, %v277_v11  ;;  %v2236_v11 = vpack.c.bf16 %v1145_v59, %v1144_v57  ;;  %v565_v57 = vld [vmem:[#allocation2 + $0x150] sm:$0xff]  ;;  %v566_v59 = vld [vmem:[#allocation2 + $0x158] sm:$0xff] }
 0x142   :  { %v556_v17 = vpop.xlane.xlu0 %555  ;;  %v462_v18 = vpop.xlane.xlu1 %461 }
 0x143   :  { %2281 = vrsqrt.f32 %v298_v15  ;;  %v463_v23 = vmul.f32 0.03125, %v462_v18  ;;  %v557_v46 = vmul.f32 0.03125, %v556_v17  ;;  %v1146_v15 = vld [vmem:[#allocation2 + $0x20] sm:$0xff] }
 0x144   :  { %2283 = vrsqrt.f32 %v195_v16  ;;  %v1147_v16 = vld [vmem:[#allocation2 + $0x28] sm:$0xff] }
 0x145   :  { %v2278_v20 = vpop.eup %2277  ;;  %2285 = vrsqrt.f32 %v278_v19  ;;  %v464_v33 = vadd.f32 1e-05, %v463_v23  ;;  %v558_v8 = vadd.f32 1e-05, %v557_v46  ;;  %v2634_v19 = vadd.f32 %v1872_v6, %v2589_v58  ;;  %v1877_v23 = vld [vmem:[#allocation2 + $0x216] ss:$0 sm:$0xff] }
 0x146   :  { %v2591_v24 = vpop.xlane.xlu0 %837  ;;  %v2593_v25 = vpop.xlane.xlu1 %649  ;;  %v748_v27 = vmul.f32 %v2278_v20, %v2501_v54  ;;  %v942_v54 = vld [vmem:[#allocation2 + $0x1d8] sm:$0xff]  ;;  %v2239_v29 = vpack.c.bf16 %v1147_v16, %v1146_v15  ;;  %v471_v46 = vld [vmem:[#allocation2 + $0x130] sm:$0xff] }
 0x147   :  { %2287 = vrsqrt.f32 %v464_v33  ;;  %v2227_v49 = vpack.c.bf16 %v942_v54, %v941_v43  ;;  %v286_v20 = vld [vmem:[#allocation2 + $0xf8] sm:$0xff]  ;;  %v156_v33 = vsel %vm155_vm4, %v2634_v19, 0.0 }
 0x148   :  { %v749_v32 = vmul.f32 %v2595_v26, %v748_v27  ;;  %2289 = vrsqrt.f32 %v558_v8 }
 0x149   :  { %v2280_v22 = vpop.eup %2279 }
 0x14a   :  { %v216_v36 = vpop.xlane.xlu0 %215  ;;  %v2601_v37 = vpop.xlane.xlu1 %1025  ;;  %v936_v40 = vmul.f32 %v2280_v22, %v2511_v62  ;;  %v750_v42 = vadd.f32 %v2598_v31, %v749_v32  ;;  %v283_v62 = vld [vmem:[#allocation2 + $0xe0] sm:$0xff] }
 0x14b   :  { %v223_v41 = vmul.f32 0.03125, %v216_v36  ;;  %v2188_v3 = vpack.c.bf16 %v284_v56, %v283_v62  ;;  %v563_v62 = vld [vmem:[#allocation2 + $0x140] sm:$0xff] }
 0x14c   :  { %2049 = vmatmul.mubr.msk.f32.vlgmr.msra.gmra.mrb[2].mxu0 %vm213_vm2, %v750_v42  ;;  %v937_v53 = vmul.f32 %v2595_v26, %v936_v40  ;;  %v469_v40 = vld [vmem:[#allocation2 + $0x120] sm:$0xff] }
 0x14d   :  { %v2606_v44 = vsub.f32 %v2556_v34, %v223_v41  ;;  %v2282_v45 = vpop.eup %2281  ;;  %2225 = vmatpush3.bf16.msra.mxu0 %v2224_v38  ;;  %2070 = vmatprep.mubr.msk.f32.mxu0 %vm2347_vm3, %v2348_v52  ;;  %v1878_v38 = vld [vmem:[#allocation2 + $0x217] ss:$0 sm:$0xff]  ;;  %v470_v41 = vld [vmem:[#allocation2 + $0x128] sm:$0xff] }
 0x14e   :  { %v222_v47 = vpop.xlane.xlu0 %221  ;;  %v219_v48 = vpop.xlane.xlu1 %218  ;;  %2226 = vmatprep.subr.bf16.mxu0 %v2346_v0  ;;  %v300_v61 = vmul.f32 %v2282_v45, %v2516_v2  ;;  %v938_v2 = vadd.f32 %v2598_v31, %v937_v53  ;;  %v2194_v43 = vpack.c.bf16 %v470_v41, %v469_v40  ;;  %v1142_v40 = vld [vmem:[#allocation2] sm:$0xff]  ;;  %v1143_v41 = vld [vmem:[#allocation2 + $0x8] sm:$0xff] }
 0x14f   :  { %v225_v50 = vmul.f32 0.03125, %v222_v47  ;;  %v224_v51 = vmul.f32 0.03125, %v219_v48  ;;  %v229_v34 = vmul.f32 %v2606_v44, %v2606_v44  ;;  %v2284_v60 = vpop.eup %2283  ;;  %v472_v47 = vld [vmem:[#allocation2 + $0x138] sm:$0xff]  ;;  %v839_v48 = vmul.f32 0.03125, %v2591_v24 }
 0x150   :  { %v2286_v63 = vpop.eup %2285  ;;  %v301_v9 = vmul.f32 %v2595_v26, %v300_v61  ;;  %v197_v14 = vmul.f32 %v2284_v60, %v2504_v55  ;;  %v285_v55 = vld [vmem:[#allocation2 + $0xf0] sm:$0xff]  ;;  %v1027_v60 = vmul.f32 0.03125, %v2601_v37  ;;  %v2203_v61 = vpack.c.bf16 %v566_v59, %v565_v57 }
 0x151   :  { %v2617_v1 = vsub.f32 %v2569_v39, %v225_v50  ;;  %v2620_v4 = vsub.f32 %v2574_v35, %v224_v51  ;;  %v232_v5 = vsel %vm213_vm2, %v229_v34, 0.0  ;;  %2228 = vmatpush3.bf16.msra.mxu0 %v2227_v49  ;;  %v280_v17 = vmul.f32 %v2286_v63, %v2523_v10  ;;  %v2288_v32 = vpop.eup %2287  ;;  %v564_v50 = vld [vmem:[#allocation2 + $0x148] sm:$0xff]  ;;  %v657_v63 = vld [vmem:[#allocation2 + $0x160] sm:$0xff]  ;;  %v659_v37 = vld [vmem:[#allocation2 + $0x170] sm:$0xff] }
 0x152   :  { %233 = vadd.xlane.f32.xlu1 %v232_v5  ;;  %2235 = vmatprep.subr.bf16.mxu0 %v2346_v0  ;;  %v302_v18 = vadd.f32 %v2598_v31, %v301_v9  ;;  %v651_v10 = vmul.f32 0.03125, %v2593_v25  ;;  %v2191_v58 = vpack.c.bf16 %v286_v20, %v285_v55  ;;  %v202_v22 = vmul.f32 %v1877_v23, %v197_v14  ;;  %v2290_v51 = vpop.eup %2289  ;;  %v658_v5 = vld [vmem:[#allocation2 + $0x168] sm:$0xff]  ;;  %v660_v14 = vld [vmem:[#allocation2 + $0x178] sm:$0xff]  ;;  %v847_v55 = vld [vmem:[#allocation2 + $0x1b0] sm:$0xff] }
 0x153   :  { %v231_v39 = vmul.f32 %v2617_v1, %v2617_v1  ;;  %v230_v35 = vmul.f32 %v2620_v4, %v2620_v4  ;;  %v281_v36 = vmul.f32 %v2595_v26, %v280_v17  ;;  %v466_v54 = vmul.f32 %v2288_v32, %v2527_v7  ;;  %v848_v20 = vld [vmem:[#allocation2 + $0x1b8] sm:$0xff]  ;;  %v1035_v32 = vld [vmem:[#allocation2 + $0x1f0] sm:$0xff] }
 0x154   :  { %2071 = vmatmul.mubr.msk.f32.vlgmr.msra.gmra.mrb[4].mxu0 %vm213_vm2, %v938_v2  ;;  %1994 = vmatmul.mubr.msk.f32.vlgmr.msra.gmra.mrb[0].mxu1 %vm213_vm2, %v302_v18  ;;  %v652_v25 = vadd.f32 1e-05, %v651_v10  ;;  %v207_v42 = vadd.f32 %v1878_v38, %v202_v22  ;;  %v2197_v7 = vpack.c.bf16 %v472_v47, %v471_v46  ;;  %v840_v34 = vadd.f32 1e-05, %v839_v48  ;;  %v1230_v46 = vld [vmem:[%s2867_s2 + $0x8] sm:$0xff]  ;;  %v1150_v47 = vld [vmem:[#allocation2 + $0x40] sm:$0xff] }
 0x155   :  { %v238_v27 = vsel %vm183_vm0, %v231_v39, 0.0  ;;  %v235_v28 = vsel %vm213_vm2, %v230_v35, 0.0  ;;  %2237 = vmatpush3.bf16.msra.mxu0 %v2236_v11  ;;  %2189 = vmatpush3.bf16.msra.mxu1 %v2188_v3  ;;  %v282_v45 = vadd.f32 %v2598_v31, %v281_v36  ;;  %v467_v49 = vmul.f32 %v2595_v26, %v466_v54  ;;  %v845_v35 = vld [vmem:[#allocation2 + $0x1a0] sm:$0xff]  ;;  %v1149_v54 = vld [vmem:[#allocation2 + $0x38] sm:$0xff]  ;;  %v1151_v48 = vld [vmem:[#allocation2 + $0x48] sm:$0xff] }
 0x156   :  { %239 = vadd.xlane.f32.xlu1 %v238_v27  ;;  %236 = vadd.xlane.f32.xlu0 %v235_v28  ;;  %2291 = vrsqrt.f32 %v652_v25  ;;  %v2200_v53 = vpack.c.bf16 %v564_v50, %v563_v62  ;;  %v560_v56 = vmul.f32 %v2290_v51, %v2535_v12  ;;  %v1028_v8 = vadd.f32 1e-05, %v1027_v60  ;;  %v1033_v28 = vld [vmem:[#allocation2 + $0x1e0] sm:$0xff] }
 0x157   :  { %2190 = vmatprep.subr.bf16.mxu1 %v2346_v0  ;;  %2238 = vmatprep.subr.bf16.mxu0 %v2346_v0  ;;  %v468_v24 = vadd.f32 %v2598_v31, %v467_v49  ;;  %2293 = vrsqrt.f32 %v840_v34  ;;  %v2206_v9 = vpack.c.bf16 %v658_v5, %v657_v63  ;;  %v2209_v2 = vpack.c.bf16 %v660_v14, %v659_v37  ;;  %v1231_v49 = vld [vmem:[%s2867_s2 + $0x10] sm:$0x3]  ;;  %v1153_v37 = vld [vmem:[#allocation2 + $0x200] sm:$0xff] }
 0x158   :  { %2004 = vmatprep.mubr.msk.f32.mxu1 %vm2347_vm3, %v2348_v52  ;;  %2092 = vmatprep.mubr.msk.f32.mxu0 %vm2347_vm3, %v2348_v52  ;;  %v561_v12 = vmul.f32 %v2595_v26, %v560_v56  ;;  %2295 = vrsqrt.f32 %v1028_v8  ;;  %v2221_v23 = vpack.c.bf16 %v848_v20, %v847_v55  ;;  %v2701_v25 = vpack.c.bf16 %v1143_v41, %v1142_v40  ;;  %v1155_v55 = vld [vmem:[#allocation2 + $0x210] sm:$0x3] }
 0x159   :  { %2240 = vmatpush3.bf16.msra.mxu0 %v2239_v29  ;;  %2192 = vmatpush3.bf16.msra.mxu1 %v2191_v58  ;;  %v1034_v29 = vld [vmem:[#allocation2 + $0x1e8] sm:$0xff] }
 0x15a   :  { %157 = vadd.xlane.f32.xlu1 %v156_v33  ;;  %2193 = vmatprep.subr.bf16.mxu1 %v2346_v0  ;;  %v562_v11 = vadd.f32 %v2598_v31, %v561_v12  ;;  %v2230_v10 = vpack.c.bf16 %v1034_v29, %v1033_v28  ;;  %v1036_v33 = vld [vmem:[#allocation2 + $0x1f8] sm:$0xff] }
 0x15b   :  { %2241 = vmatprep.subr.bf16.mxu0 %v2346_v0  ;;  %v2233_v36 = vpack.c.bf16 %v1036_v33, %v1035_v32 }
 0x15c   :  { %2093 = vmatmul.mubr.msk.f32.vlgmr.msra.gmra.mrb[6].mxu0 %vm213_vm2, %v207_v42  ;;  %2005 = vmatmul.mubr.msk.f32.vlgmr.msra.gmra.mrb[2].mxu1 %vm213_vm2, %v282_v45  ;;  %v1229_v42 = vld [vmem:[%s2867_s2] sm:$0xff] }
 0x15d   :  { %2110 = vmatprep.mubr.msk.f32.mxu0 %vm2347_vm3, %v2348_v52  ;;  %2195 = vmatpush3.bf16.msra.mxu1 %v2194_v43  ;;  %v1148_v43 = vld [vmem:[#allocation2 + $0x30] sm:$0xff] }
 0x15e   :  { %2015 = vmatprep.mubr.msk.f32.mxu1 %vm2347_vm3, %v2348_v52  ;;  %2196 = vmatprep.subr.bf16.mxu1 %v2346_v0  ;;  %v2245_v45 = vpack.c.bf16 %v1149_v54, %v1148_v43 }
 0x15f   :  { %2243 = vmatpush3.bf16.msra.mxu0 %v2701_v25 }
 0x160   :  { %v2292_v6 = vpop.eup %2291  ;;  %2250 = vmatprep.subr.bf16.mxu0 %v2346_v0 }
 0x161   :  { %2198 = vmatpush3.bf16.msra.mxu1 %v2197_v7  ;;  %v654_v3 = vmul.f32 %v2292_v6, %v2539_v13  ;;  %v846_v13 = vld [vmem:[#allocation2 + $0x1a8] sm:$0xff]  ;;  %v2294_v15 = vpop.eup %2293  ;;  %v2248_v7 = vpack.c.bf16 %v1151_v48, %v1150_v47 }
 0x162   :  { %2199 = vmatprep.subr.bf16.mxu1 %v2346_v0  ;;  %v2218_v16 = vpack.c.bf16 %v846_v13, %v845_v35  ;;  %v842_v17 = vmul.f32 %v2294_v15, %v2547_v21  ;;  %v2296_v21 = vpop.eup %2295  ;;  %2111 = vmatmul.mubr.msk.f32.vlgmr.msra.gmra.mrb[8].mxu0 %vm80_vm1, %v1229_v42 }
 0x163   :  { %v655_v39 = vmul.f32 %v2595_v26, %v654_v3  ;;  %v1030_v58 = vmul.f32 %v2296_v21, %v2559_v30  ;;  %2113 = vmatprep.mubr.msk.f32.mxu0 %vm2347_vm3, %v2348_v52  ;;  %2252 = vmatpush3.bf16.msra.mxu0 %v2245_v45 }
 0x164   :  { %2016 = vmatmul.mubr.msk.f32.vlgmr.msra.gmra.mrb[4].mxu1 %vm213_vm2, %v468_v24  ;;  %v843_v27 = vmul.f32 %v2595_v26, %v842_v17  ;;  %2253 = vmatprep.subr.bf16.mxu0 %v2346_v0 }
 0x165   :  { %2201 = vmatpush3.bf16.msra.mxu1 %v2200_v53  ;;  %2026 = vmatprep.mubr.msk.f32.mxu1 %vm2347_vm3, %v2348_v52  ;;  %v656_v18 = vadd.f32 %v2598_v31, %v655_v39  ;;  %v1031_v38 = vmul.f32 %v2595_v26, %v1030_v58 }
 0x166   :  { %2202 = vmatprep.subr.bf16.mxu1 %v2346_v0  ;;  %v844_v22 = vadd.f32 %v2598_v31, %v843_v27  ;;  %2114 = vmatmul.mubr.msk.f32.gmra.mrb[10].mxu0 %vm80_vm1, %v1230_v46 }
 0x167   :  { %v1032_v30 = vadd.f32 %v2598_v31, %v1031_v38  ;;  %2116 = vmatprep.mubr.msk.f32.mxu0 %vm2347_vm3, %v2348_v52  ;;  %2255 = vmatpush3.bf16.msra.mxu0 %v2248_v7 }
 0x168   :  { %2256 = vmatprep.subr.bf16.mxu0 %v2346_v0 }
 0x169   :  { %2204 = vmatpush3.bf16.msra.mxu1 %v2203_v61 }
 0x16a   :  { %2205 = vmatprep.subr.bf16.mxu1 %v2346_v0  ;;  %2117 = vmatmul.mubr.msk.f32.gmra.mrb[12].mxu0 %vm80_vm1, %v1231_v49 }
 0x16b   :  { %2144 = vmatprep.mubr.msk.f32.mxu0 %vm2347_vm3, %v2348_v52 }
 0x16c   :  { %2027 = vmatmul.mubr.msk.f32.vlgmr.msra.gmra.mrb[6].mxu1 %vm213_vm2, %v562_v11 }
 0x16d   :  { %2207 = vmatpush3.bf16.msra.mxu1 %v2206_v9  ;;  %2037 = vmatprep.mubr.msk.f32.mxu1 %vm2347_vm3, %v2348_v52 }
 0x16e   :  { %2208 = vmatprep.subr.bf16.mxu1 %v2346_v0 }
 0x171   :  { %2210 = vmatpush3.bf16.msra.mxu1 %v2209_v2 }
 0x172   :  { %2217 = vmatprep.subr.bf16.mxu1 %v2346_v0 }
 0x174   :  { %2038 = vmatmul.mubr.msk.f32.vlgmr.msra.gmra.mrb[8].mxu1 %vm213_vm2, %v656_v18 }
 0x175   :  { %2219 = vmatpush3.bf16.msra.mxu1 %v2218_v16  ;;  %2059 = vmatprep.mubr.msk.f32.mxu1 %vm2347_vm3, %v2348_v52  ;;  %v1154_v16 = vld [vmem:[#allocation2 + $0x208] sm:$0xff] }
 0x176   :  { %2220 = vmatprep.subr.bf16.mxu1 %v2346_v0 }
 0x179   :  { %2222 = vmatpush3.bf16.msra.mxu1 %v2221_v23 }
 0x17a   :  { %2229 = vmatprep.subr.bf16.mxu1 %v2346_v0 }
 0x17c   :  { %2060 = vmatmul.mubr.msk.f32.vlgmr.msra.gmra.mrb[10].mxu1 %vm213_vm2, %v844_v22 }
 0x17d   :  { %2231 = vmatpush3.bf16.msra.mxu1 %v2230_v10  ;;  %2081 = vmatprep.mubr.msk.f32.mxu1 %vm2347_vm3, %v2348_v52 }
 0x17e   :  { %2232 = vmatprep.subr.bf16.mxu1 %v2346_v0 }
 0x181   :  { %2234 = vmatpush3.bf16.msra.mxu1 %v2233_v36 }
 0x182   :  { %2095 = vmatprep.subr.mxu1 %v2348_v52 }
 0x184   :  { %2082 = vmatmul.mubr.msk.f32.vlgmr.msra.gmra.mrb[12].mxu1 %vm213_vm2, %v1032_v30 }
 0x185   :  { %2097 = vmatprep.mubr.msk.f32.mxu1 %vm2347_vm3, %v2348_v52 }
 0x1df   :  { %v234_v62 = vpop.xlane.xlu1 %233 }
 0x1e0   :  { %v241_v57 = vmul.f32 0.03125, %v234_v62 }
 0x1e2   :  { %v244_v12 = vadd.f32 1e-05, %v241_v57 }
 0x1e3   :  { %v240_v50 = vpop.xlane.xlu1 %239  ;;  %v237_v59 = vpop.xlane.xlu0 %236 }
 0x1e4   :  { %v242_v63 = vmul.f32 0.03125, %v237_v59  ;;  %2297 = vrsqrt.f32 %v244_v12  ;;  %v243_v6 = vmul.f32 0.03125, %v240_v50 }
 0x1e6   :  { %v245_v5 = vadd.f32 1e-05, %v242_v63  ;;  %v246_v11 = vadd.f32 1e-05, %v243_v6 }
 0x1e7   :  { %v158_v51 = vpop.xlane.xlu1 %157 }
 0x1e8   :  { %v160_v34 = vmul.f32 0.0625, %v158_v51  ;;  %2299 = vrsqrt.f32 %v245_v5 }
 0x1e9   :  { %2301 = vrsqrt.f32 %v246_v11  ;;  %v2763_v11 = vld [vmem:[#allocation2 + $0x212] ss:$0 sm:$0xff] }
 0x1ea   :  { %v2726_v53 = vsub.f32 %v2634_v19, %v160_v34 }
 0x1ec   :  { %v162_v56 = vmul.f32 %v2726_v53, %v2726_v53 }
 0x1ee   :  { %v163_v24 = vsel %vm155_vm4, %v162_v56, 0.0  ;;  %v2298_v2 = vpop.eup %2297 }
 0x1ef   :  { %164 = vadd.xlane.f32.xlu1 %v163_v24  ;;  %v250_v17 = vmul.f32 %v2298_v2, %v2606_v44 }
 0x1f1   :  { %v257_v20 = vmul.f32 %v2595_v26, %v250_v17 }
 0x1f2   :  { %v2300_v18 = vpop.eup %2299 }
 0x1f3   :  { %v251_v23 = vmul.f32 %v2300_v18, %v2620_v4  ;;  %v2302_v27 = vpop.eup %2301 }
 0x1f4   :  { %v252_v10 = vmul.f32 %v2302_v27, %v2617_v1 }
 0x1f5   :  { %v258_v44 = vmul.f32 %v2595_v26, %v251_v23 }
 0x1f6   :  { %v259_v58 = vmul.f32 %v2595_v26, %v252_v10 }
 0x1f7   :  { %v265_v4 = vadd.f32 %v2598_v31, %v258_v44 }
 0x1f8   :  { %v266_v36 = vadd.f32 %v2598_v31, %v259_v58 }
 0x21f   :  { %v824_v60 = vpop.f32.mrb[2].mxu0 }
 0x220   :  { %v2050_v61 = vpop.f32.mrb[3].mxu0 }
 0x227   :  { %v1012_v8 = vpop.f32.mrb[4].mxu0  ;;  %v376_v9 = vpop.f32.mrb[0].mxu1 }
 0x228   :  { %v2072_v3 = vpop.f32.mrb[5].mxu0  ;;  %v1995_v19 = vpop.f32.mrb[1].mxu1 }
 0x22f   :  { %v2731_v14 = vpop.f32.mrb[6].mxu0  ;;  %v449_v39 = vpop.f32.mrb[2].mxu1 }
 0x230   :  { %v2094_v35 = vpop.f32.mrb[7].mxu0  ;;  %2096 = vmatpush3.msk.msra.mxu1 %vm1242_vm5, %v2731_v14  ;;  %v450_v13 = vadd.f32 %v449_v39, %v376_v9  ;;  %v2006_v15 = vpop.f32.mrb[3].mxu1 }
 0x231   :  { %2098 = vmatmul.mubr.msk.f32.vlgmr.msra.gmra.mrb[14].mxu1 %vm1232_vm6, %v1153_v37  ;;  %2244 = vmatprep.subr.bf16.mxu1 %v2346_v0 }
 0x232   :  { %2100 = vmatprep.mubr.msk.f32.mxu1 %vm2347_vm3, %v2348_v52  ;;  %2246 = vmatpush3.bf16.msra.mxu1 %v2245_v45  ;;  %v1890_v45 = vld [vmem:[#allocation2 + $0x21a] ss:$0 sm:$0xff] }
 0x233   :  { %2247 = vmatprep.subr.bf16.mxu1 %v2346_v0  ;;  %v264_v0 = vadd.f32 %v2598_v31, %v257_v20 }
 0x235   :  { %2101 = vmatmul.mubr.msk.f32.gmra.mrb[16].mxu1 %vm1232_vm6, %v1154_v16  ;;  %v1401_v49 = vpop.f32.mrb[8].mxu0 }
 0x236   :  { %2103 = vmatprep.mubr.msk.f32.mxu1 %vm2347_vm3, %v2348_v52  ;;  %2249 = vmatpush3.bf16.msra.mxu1 %v2248_v7  ;;  %v2112_v31 = vpop.f32.mrb[9].mxu0 }
 0x237   :  { %v542_v28 = vpop.f32.mrb[4].mxu1 }
 0x238   :  { %v546_v29 = vadd.f32 %v542_v28, %v450_v13  ;;  %v2017_v21 = vpop.f32.mrb[5].mxu1 }
 0x239   :  { %2104 = vmatmul.mubr.msk.f32.gmra.mrb[18].mxu1 %vm1232_vm6, %v1155_v55  ;;  %v1406_v62 = vpop.f32.mrb[10].mxu0  ;;  %v2349_v21 = vmov 0  }
 0x23a   :  { %2127 = vmatprep.mubr.msk.f32.mxu1 %vm2347_vm3, %v2348_v52  ;;  %v2115_v50 = vpop.f32.mrb[11].mxu0  ;;  %2275 = vset.pattern.permute.xlu1 %v2349_v21 }
 0x23b   :  { %2276 = vset.pattern.permute.xlu0 %v2349_v21  ;;  %v1780_v50 = vld [vmem:[%s2873_s8] sm:$0xff] }
 0x23d   :  { %2128 = vmatmul.mubr.msk.f32.vlgmr.msra.gmra.mrb[20].mxu1 %vm213_vm2, %v264_v0  ;;  %v1411_v51 = vpop.f32.mrb[12].mxu0 }
 0x23e   :  { %2130 = vmatprep.mubr.msk.f32.mxu1 %vm2347_vm3, %v2348_v52  ;;  %v2118_v34 = vpop.f32.mrb[13].mxu0 }
 0x23f   :  { %v636_v22 = vpop.f32.mrb[6].mxu1  ;;  %v1782_v34 = vld [vmem:[%s2873_s8 + $0x10] sm:$0x3] }
 0x240   :  { %v640_v32 = vadd.f32 %v636_v22, %v546_v29  ;;  %v2028_v33 = vpop.f32.mrb[7].mxu1 }
 0x241   :  { %2131 = vmatmul.mubr.msk.f32.gmra.mrb[22].mxu1 %vm213_vm2, %v265_v4 }
 0x242   :  { %2133 = vmatprep.mubr.msk.f32.mxu1 %vm2347_vm3, %v2348_v52 }
 0x245   :  { %2134 = vmatmul.mubr.msk.f32.gmra.mrb[24].mxu1 %vm213_vm2, %v266_v36  ;;  %v1891_v36 = vld [vmem:[#allocation2 + $0x21b] ss:$0 sm:$0xff] }
 0x247   :  { %v730_v1 = vpop.f32.mrb[8].mxu1 }
 0x248   :  { %v734_v38 = vadd.f32 %v730_v1, %v640_v32  ;;  %v2039_v30 = vpop.f32.mrb[9].mxu1 }
 0x249   :  { %v1892_v30 = vld [vmem:[#allocation2 + $0x21c] ss:$0 sm:$0xff] }
 0x24a   :  { %v828_v40 = vadd.f32 %v824_v60, %v734_v38 }
 0x24f   :  { %v918_v41 = vpop.f32.mrb[10].mxu1 }
 0x250   :  { %v922_v42 = vadd.f32 %v918_v41, %v828_v40  ;;  %v2061_v43 = vpop.f32.mrb[11].mxu1  ;;  %v1875_v40 = vld [vmem:[#allocation2 + $0x214] ss:$0 sm:$0xff] }
 0x252   :  { %v1016_v26 = vadd.f32 %v1012_v8, %v922_v42 }
 0x257   :  { %v1106_v54 = vpop.f32.mrb[12].mxu1 }
 0x258   :  { %v1110_v46 = vadd.f32 %v1106_v54, %v1016_v26  ;;  %v2083_v47 = vpop.f32.mrb[13].mxu1  ;;  %v1876_v26 = vld [vmem:[#allocation2 + $0x215] ss:$0 sm:$0xff] }
 0x25a   :  { %v1116_v48 = vadd.f32 %v1890_v45, %v1110_v46 }
 0x25c   :  { %v1119_v7 = vsel %vm183_vm0, %v1116_v48, 0.0 }
 0x25d   :  { %1120 = vadd.xlane.f32.xlu0 %v1119_v7 }
 0x27c   :  { %v165_v0 = vpop.xlane.xlu1 %164 }
 0x27d   :  { %v166_v44 = vmul.f32 0.0625, %v165_v0 }
 0x27f   :  { %v167_v10 = vadd.f32 1e-05, %v166_v44 }
 0x281   :  { %2303 = vrsqrt.f32 %v167_v10 }
 0x28b   :  { %v2304_v32 = vpop.eup %2303 }
 0x28c   :  { %v169_v1 = vmul.f32 %v2304_v32, %v2726_v53 }
 0x28e   :  { %v174_v43 = vmul.f32 %v1875_v40, %v169_v1 }
 0x290   :  { %v179_v54 = vadd.f32 %v1876_v26, %v174_v43 }
 0x2ea   :  { %v1121_v56 = vpop.xlane.xlu0 %1120 }
 0x2eb   :  { %v1122_v24 = vmul.f32 0.03125, %v1121_v56 }
 0x2ed   :  { %v1123_v57 = vsub.f32 %v1116_v48, %v1122_v24  ;;  %v1781_v24 = vld [vmem:[%s2873_s8 + $0x8] sm:$0xff] }
 0x2ef   :  { %v1124_v59 = vmul.f32 %v1123_v57, %v1123_v57 }
 0x2f1   :  { %v1125_v60 = vsel %vm183_vm0, %v1124_v59, 0.0  ;;  %v1679_v59 = vld [vmem:[%s2872_s7] sm:$0xff]  ;;  %vm1863_vm0 = vcmask 57400  }
 0x2f2   :  { %1126 = vadd.xlane.f32.xlu0 %v1125_v60  ;;  %v1681_v60 = vld [vmem:[%s2872_s7 + $0x10] sm:$0x3] }
 0x304   :  { %v1312_v61 = vpop.f32.mrb[14].mxu1 }
 0x305   :  { %v2099_v12 = vpop.f32.mrb[15].mxu1  ;;  %v1402_v63 = vadd.f32 %v1401_v49, %v1312_v61 }
 0x308   :  { %v1317_v5 = vpop.f32.mrb[16].mxu1 }
 0x309   :  { %v2102_v6 = vpop.f32.mrb[17].mxu1  ;;  %v1407_v8 = vadd.f32 %v1406_v62, %v1317_v5  ;;  %v1907_v5 = vld [vmem:[#allocation2 + $0x21d] ss:$0 sm:$0xff] }
 0x30c   :  { %v1322_v9 = vpop.f32.mrb[18].mxu1 }
 0x30d   :  { %v2105_v3 = vpop.f32.mrb[19].mxu1  ;;  %v1412_v19 = vadd.f32 %v1411_v51, %v1322_v9 }
 0x310   :  { %v1490_v37 = vpop.f32.mrb[20].mxu1 }
 0x311   :  { %v1504_v2 = vadd.f32 %v1490_v37, %v1402_v63  ;;  %v2129_v39 = vpop.f32.mrb[21].mxu1 }
 0x313   :  { %v2766_v35 = vadd.f32 %v2763_v11, %v1504_v2 }
 0x314   :  { %v1495_v13 = vpop.f32.mrb[22].mxu1 }
 0x315   :  { %1857 = vst [vmem:[%s2874_s9] sm:$0xff] %v2766_v35  ;;  %v1505_v15 = vadd.f32 %v1495_v13, %v1407_v8  ;;  %v2132_v16 = vpop.f32.mrb[23].mxu1  ;;  %v1730_v17 = vsel %vm1729_vm7, %v2766_v35, -inf }
 0x316   :  { %1731 = vmax.xlane.f32.xlu0 %v1730_v17 }
 0x317   :  { %v2774_v18 = vadd.f32 %v2763_v11, %v1505_v15 }
 0x318   :  { %v1500_v55 = vpop.f32.mrb[24].mxu1 }
 0x319   :  { %1858 = vst [vmem:[%s2874_s9 + $0x8] sm:$0xff] %v2774_v18  ;;  %v1506_v20 = vadd.f32 %v1500_v55, %v1412_v19  ;;  %v2135_v23 = vpop.f32.mrb[25].mxu1  ;;  %v1733_v27 = vsel %vm1729_vm7, %v2774_v18, -inf }
 0x31a   :  { %1734 = vmax.xlane.f32.xlu1 %v1733_v27 }
 0x31b   :  { %v2782_v28 = vadd.f32 %v2763_v11, %v1506_v20 }
 0x31d   :  { %1859 = vst [vmem:[%s2874_s9 + $0x10] sm:$0x3] %v2782_v28  ;;  %v1737_v29 = vsel %vm1736_vm8, %v2782_v28, -inf }
 0x31e   :  { %1738 = vmax.xlane.f32.xlu0 %v1737_v29 }
 0x37f   :  { %v1127_v4 = vpop.xlane.xlu0 %1126 }
 0x380   :  { %v1128_v58 = vmul.f32 0.03125, %v1127_v4 }
 0x382   :  { %v1129_v22 = vadd.f32 1e-05, %v1128_v58 }
 0x384   :  { %2305 = vrsqrt.f32 %v1129_v22 }
 0x38e   :  { %v2306_v33 = vpop.eup %2305 }
 0x38f   :  { %v1131_v38 = vmul.f32 %v2306_v33, %v1123_v57  ;;  %v1680_v57 = vld [vmem:[%s2872_s7 + $0x8] sm:$0xff]  ;;  %s2352_s7 = smov 126  }
 0x391   :  { %v1136_v41 = vmul.f32 %v1891_v36, %v1131_v38 }
 0x393   :  { %v1141_v42 = vadd.f32 %v1892_v30, %v1136_v41 }
 0x395   :  { %2145 = vmatmul.mubr.msk.f32.vlgmr.msra.gmra.mrb[14].mxu0 %vm213_vm2, %v1141_v42 }
 0x396   :  { %2258 = vmatpush3.bf16.msra.mxu0 %v2701_v25  ;;  %2151 = vmatprep.mubr.msk.f32.mxu0 %vm2347_vm3, %v2348_v52 }
 0x399   :  { %2152 = vmatmul.mubr.msk.f32.vlgmr.msra.gmra.mrb[16].mxu0 %vm80_vm1, %v179_v54  ;;  %vm1865_vm1 = vcmask 65600  }
 0x3a3   :  { %v2795_v45 = vpop.xlane.xlu0 %1731 }
 0x3a4   :  { %v1740_v53 = vsub.f32 %v2766_v35, %v2795_v45 }
 0x3a6   :  { %v1743_v46 = vmul.f32 1.442695, %v1740_v53 }
 0x3a7   :  { %v2799_v47 = vpop.xlane.xlu1 %1734 }
 0x3a8   :  { %2307 = vpow2.f32 %v1743_v46  ;;  %v1741_v48 = vsub.f32 %v2774_v18, %v2799_v47 }
 0x3aa   :  { %v1745_v7 = vmul.f32 1.442695, %v1741_v48 }
 0x3ab   :  { %v2803_v25 = vpop.xlane.xlu0 %1738 }
 0x3ac   :  { %2309 = vpow2.f32 %v1745_v7  ;;  %v1742_v49 = vsub.f32 %v2782_v28, %v2803_v25 }
 0x3ae   :  { %v1747_v31 = vmul.f32 1.442695, %v1742_v49 }
 0x3b0   :  { %2311 = vpow2.f32 %v1747_v31 }
 0x3b2   :  { %v2308_v62 = vpop.eup %2307 }
 0x3b3   :  { %1752 = vrot.lane.b32.xlu1 %v2308_v62, %s2350_s13 }
 0x3b6   :  { %v2310_v51 = vpop.eup %2309 }
 0x3b7   :  { %1785 = vperm.xlu1 %2275, %v1780_v50   ;;  %1754 = vrot.lane.b32.xlu0 %v2310_v51, %s2350_s13 }
 0x3ba   :  { %v2312_v56 = vpop.eup %2311 }
 0x3bb   :  { %1756 = vrot.lane.b32.xlu1 %v2312_v56, %s2350_s13  ;;  %1795 = vperm.xlu0 %2276, %v1782_v34  }
 0x3bf   :  { %1790 = vperm.xlu1 %2275, %v1781_v24   ;;  %1818 = vrot.lane.b32.xlu0 %v2782_v28, %s2350_s13 }
 0x3c3   :  { %1814 = vrot.lane.b32.xlu1 %v2766_v35, %s2350_s13  ;;  %1687 = vrot.lane.b32.xlu0 %v1680_v57, %s2351_s5 }
 0x3c7   :  { %1816 = vrot.lane.b32.xlu1 %v2774_v18, %s2350_s13 }
 0x3cb   :  { %1685 = vrot.lane.b32.xlu1 %v1679_v59, %s2351_s5 }
 0x3cf   :  { %1689 = vrot.lane.b32.xlu1 %v1681_v60, %s2351_s5 }
 0x425   :  { %v1753_v61 = vpop.permute.xlu1 %1752 }
 0x426   :  { %v1761_v21 = vsel %vm1232_vm6, %v1753_v61, 0.0 }
 0x429   :  { %v1755_v12 = vpop.permute.xlu0 %1754 }
 0x42a   :  { %v1764_v16 = vsel %vm1232_vm6, %v1755_v12, 0.0 }
 0x436   :  { %v1786_v63 = vpop.permute.xlu1 %1785 }
 0x437   :  { %vm1802_vm10 = vcmp.eq.f32.partialorder %v1786_v63, %v1907_v5 }
 0x438   :  { %v1908_v39 = vsel %vm1802_vm10, 1.0, %v2348_v52 }
 0x43a   :  { %v1796_v6 = vpop.permute.xlu0 %1795  ;;  %v1757_v8 = vpop.permute.xlu1 %1756 }
 0x43b   :  { %vm1804_vm9 = vcmp.eq.f32.partialorder %v1796_v6, %v1907_v5  ;;  %v1767_v10 = vsel %vm1665_vm11, %v1757_v8, 0.0 }
 0x43c   :  { %v1910_v9 = vsel %vm1804_vm9, 1.0, %v2348_v52 }
 0x43e   :  { %v1819_v3 = vpop.permute.xlu0 %1818  ;;  %v1791_v19 = vpop.permute.xlu1 %1790 }
 0x43f   :  { %v1825_v37 = vmul.f32 %v1910_v9, %v1819_v3  ;;  %vm1803_vm12 = vcmp.eq.f32.partialorder %v1791_v19, %v1907_v5 }
 0x440   :  { %v1909_v55 = vsel %vm1803_vm12, 1.0, %v2348_v52 }
 0x441   :  { %v1832_v2 = vsel %vm1665_vm11, %v1825_v37, 0.0 }
 0x442   :  { %1833 = vadd.xlane.f32.xlu1 %v1832_v2  ;;  %v1815_v13 = vpop.permute.xlu1 %1814  ;;  %v1688_v0 = vpop.permute.xlu0 %1687 }
 0x443   :  { %v1823_v15 = vmul.f32 %v1908_v39, %v1815_v13  ;;  %v1695_v44 = vsub.f32 %v2774_v18, %v1688_v0 }
 0x445   :  { %v1826_v17 = vsel %vm1232_vm6, %v1823_v15, 0.0  ;;  %v1698_v58 = vmul.f32 %v1695_v44, %v1695_v44 }
 0x446   :  { %1765 = vadd.xlane.f32.xlu1 %v1764_v16  ;;  %1827 = vadd.xlane.f32.xlu0 %v1826_v17  ;;  %v1817_v20 = vpop.permute.xlu1 %1816 }
 0x447   :  { %v1824_v23 = vmul.f32 %v1909_v55, %v1817_v20 }
 0x449   :  { %v1829_v27 = vsel %vm1232_vm6, %v1824_v23, 0.0 }
 0x44a   :  { %1830 = vadd.xlane.f32.xlu0 %v1829_v27  ;;  %v1686_v29 = vpop.permute.xlu1 %1685 }
 0x44b   :  { %v1694_v32 = vsub.f32 %v2766_v35, %v1686_v29 }
 0x44d   :  { %v1697_v33 = vmul.f32 %v1694_v32, %v1694_v32 }
 0x44e   :  { %1762 = vadd.xlane.f32.xlu0 %v1761_v21  ;;  %v1690_v4 = vpop.permute.xlu1 %1689 }
 0x44f   :  { %v1696_v22 = vsub.f32 %v2782_v28, %v1690_v4  ;;  %v1662_v28 = vld [vmem:[%s2871_s6] sm:$0x3] }
 0x451   :  { %v1699_v52 = vmul.f32 %v1696_v22, %v1696_v22 }
 0x452   :  { %1768 = vadd.xlane.f32.xlu0 %v1767_v10 }
 0x457   :  { %1705 = vrot.lane.b32.xlu1 %v1698_v58, %s2352_s7 }
 0x45b   :  { %1707 = vrot.lane.b32.xlu1 %v1699_v52, %s2352_s7 }
 0x468   :  { %1703 = vrot.lane.b32.xlu0 %v1697_v33, %s2352_s7  ;;  %v1583_v36 = vpop.f32.mrb[14].mxu0 }
 0x469   :  { %v2146_v1 = vpop.f32.mrb[15].mxu0 }
 0x46c   :  { %v1656_v38 = vpop.f32.mrb[16].mxu0 }
 0x46d   :  { %v1657_v30 = vadd.f32 %v1656_v38, %v1583_v36  ;;  %v2153_v18 = vpop.f32.mrb[17].mxu0 }
 0x46f   :  { %v1660_v40 = vadd.f32 %v1657_v30, %v2731_v14 }
 0x471   :  { %v1661_v41 = vadd.f32 %v2763_v11, %v1660_v40 }
 0x473   :  { %1860 = vst.msk [vmem:[%s2874_s9] sm:$0x3] %vm1665_vm11, %v1661_v41  ;;  %v1663_v35 = vsub.f32 %v1661_v41, %v1662_v28 }
 0x475   :  { %v1664_v42 = vmul.f32 %v1663_v35, %v1663_v35 }
 0x477   :  { %v1666_v43 = vsel %vm1665_vm11, %v1664_v42, 0.0 }
 0x47f   :  { %1667 = vadd.xlane.f32.xlu1 %v1666_v43 }
 0x4cf   :  { %v1834_v26 = vpop.xlane.xlu1 %1833 }
 0x4d3   :  { %v1828_v54 = vpop.xlane.xlu0 %1827  ;;  %v1766_v53 = vpop.xlane.xlu1 %1765 }
 0x4d4   :  { %2313 = vlog2.f32 %v1766_v53 }
 0x4d7   :  { %v1831_v14 = vpop.xlane.xlu0 %1830  ;;  %v1706_v46 = vpop.permute.xlu1 %1705 }
 0x4d8   :  { %v1713_v50 = vsel %vm1232_vm6, %v1706_v46, 0.0 }
 0x4db   :  { %v1763_v11 = vpop.xlane.xlu0 %1762  ;;  %v1708_v31 = vpop.permute.xlu1 %1707 }
 0x4dc   :  { %2315 = vlog2.f32 %v1763_v11  ;;  %v1715_v24 = vsel %vm1665_vm11, %v1708_v31, 0.0 }
 0x4de   :  { %v2314_v7 = vpop.eup %2313 }
 0x4df   :  { %v1769_v48 = vpop.xlane.xlu0 %1768  ;;  %v1773_v49 = vmul.f32 0.6931472, %v2314_v7 }
 0x4e0   :  { %2317 = vlog2.f32 %v1769_v48 }
 0x4e1   :  { %v1777_v57 = vadd.f32 %v1773_v49, %v2799_v47 }
 0x4e3   :  { %v1704_v62 = vpop.permute.xlu0 %1703  ;;  %v1836_v63 = vsub.f32 %v1777_v57, %v1831_v14 }
 0x4e4   :  { %v1712_v51 = vsel %vm1232_vm6, %v1704_v62, 0.0 }
 0x4e5   :  { %v1714_v34 = vadd.f32 %v1713_v50, %v1712_v51  ;;  %v1840_v3 = vsel %vm1838_vm13, %v1836_v63, 0.0 }
 0x4e6   :  { %v2316_v56 = vpop.eup %2315 }
 0x4e7   :  { %v1771_v59 = vmul.f32 0.6931472, %v2316_v56  ;;  %v1716_v60 = vadd.f32 %v1715_v24, %v1714_v34 }
 0x4e9   :  { %v1776_v61 = vadd.f32 %v1771_v59, %v2795_v45  ;;  %1717 = vadd.xlane.f32.xlu0 %v1716_v60 }
 0x4ea   :  { %v2318_v12 = vpop.eup %2317 }
 0x4eb   :  { %v1775_v5 = vmul.f32 0.6931472, %v2318_v12  ;;  %v1835_v6 = vsub.f32 %v1776_v61, %v1828_v54 }
 0x4ed   :  { %v1778_v8 = vadd.f32 %v1775_v5, %v2803_v25  ;;  %v1839_v9 = vsel %vm1838_vm13, %v1835_v6, 0.0 }
 0x4ee   :  { %v1841_v37 = vadd.f32 %v1840_v3, %v1839_v9 }
 0x4ef   :  { %v1837_v19 = vsub.f32 %v1778_v8, %v1834_v26 }
 0x4f1   :  { %v1843_v2 = vsel %vm1842_vm14, %v1837_v19, 0.0 }
 0x4f2   :  { %v1844_v39 = vadd.f32 %v1843_v2, %v1841_v37 }
 0x4f4   :  { %1845 = vadd.xlane.f32.xlu0 %v1844_v39 }
 0x50c   :  { %v1668_v47 = vpop.xlane.xlu1 %1667 }
 0x50d   :  { %v1669_v13 = vrot.slane %v1668_v47, 4 }
 0x50f   :  { %v1670_v15 = vadd.f32 %v1669_v13, %v1668_v47 }
 0x511   :  { %v1671_v45 = vrot.slane %v1670_v15, 2 }
 0x513   :  { %v1672_v16 = vadd.f32 %v1671_v45, %v1670_v15 }
 0x515   :  { %v1673_v17 = vrot.slane %v1672_v16, 1 }
 0x517   :  { %v1674_v55 = vadd.f32 %v1673_v17, %v1672_v16 }
 0x519   :  { %2259 = vpush %v1674_v55 }
 0x54a   :  { %s2260_s6 = spop %2259 }
 0x54b   :  { %v1676_v20 = vstv %s2260_s6 }
 0x54c   :  { %v1678_v25 = vmul.f32 0.25, %v1676_v20 }
 0x54e   :  { %1862 = vst.msk [vmem:[%s2874_s9] sm:$0x1] %vm1861_vm15, %v1678_v25 }
 0x576   :  { %v1718_v23 = vpop.xlane.xlu0 %1717 }
 0x577   :  { %v1719_v27 = vrot.slane %v1718_v23, 4 }
 0x579   :  { %v1720_v29 = vadd.f32 %v1719_v27, %v1718_v23 }
 0x57b   :  { %v1721_v21 = vrot.slane %v1720_v29, 2 }
 0x57d   :  { %v1722_v0 = vadd.f32 %v1721_v21, %v1720_v29 }
 0x57f   :  { %v1723_v44 = vrot.slane %v1722_v0, 1 }
 0x581   :  { %v1846_v10 = vpop.xlane.xlu0 %1845  ;;  %v1724_v4 = vadd.f32 %v1723_v44, %v1722_v0 }
 0x582   :  { %v1847_v58 = vrot.slane %v1846_v10, 4 }
 0x583   :  { %2261 = vpush %v1724_v4 }
 0x584   :  { %v1848_v22 = vadd.f32 %v1847_v58, %v1846_v10 }
 0x586   :  { %v1849_v52 = vrot.slane %v1848_v22, 2 }
 0x588   :  { %v1850_v32 = vadd.f32 %v1849_v52, %v1848_v22 }
 0x58a   :  { %v1851_v33 = vrot.slane %v1850_v32, 1 }
 0x58c   :  { %v1852_v36 = vadd.f32 %v1851_v33, %v1850_v32 }
 0x58e   :  { %2263 = vpush %v1852_v36 }
 0x5b4   :  { %s2262_s28 = spop %2261 }
 0x5b5   :  { %v1726_v1 = vstv %s2262_s28 }
 0x5b6   :  { %v1728_v38 = vmul.f32 0.027777778, %v1726_v1 }
 0x5b8   :  { %1864 = vst.msk [vmem:[%s2874_s9] sm:$0x1] %vm1863_vm0, %v1728_v38 }
 0x5bf   :  { %s2264_s3 = spop %2263 }
 0x5c0   :  { %v1854_v30 = vstv %s2264_s3 }
 0x5c1   :  { %v1856_v18 = vmul.f32 0.055555556, %v1854_v30 }
 0x5c3   :  { %1866 = vst.msk [vmem:[%s2874_s9] sm:$0x1] %vm1865_vm1, %v1856_v18 }
 0x5c4   :  { %1871 = vsyncpa [#allocation3], 1 }

</bundles_post_ra>
